<compile_context>
chip_gen: v5e
topology: v5e:2x2
jax: 0.10.0
libtpu: 0.0.40
codegen_flags: <defaults>
</compile_context>

<pallas_src>
import functools
import numpy as np
import jax
import jax.numpy as jnp
from jax import lax
from jax.experimental import pallas as pl
from jax.experimental.pallas import tpu as pltpu

E = 128          # embed dim (fixed by module)
H = 8            # num heads
D = E // H       # head dim = 16
FF = 512         # feed-forward hidden
EPS = 1e-5       # nn.LayerNorm default eps


def _layernorm(x, gamma, beta):
    mu = jnp.mean(x, axis=-1, keepdims=True)
    var = jnp.mean((x - mu) ** 2, axis=-1, keepdims=True)
    return (x - mu) * lax.rsqrt(var + EPS) * gamma + beta


def selfattn_kernel(x_ref, wqkv_ref, bqkv_ref, wo_ref, bo_ref,
                    w1_ref, b1_ref, w2_ref, b2_ref,
                    g1_ref, be1_ref, g2_ref, be2_ref,
                    o_ref, qkv_ref, ctx_ref,
                    *, block_b, seq, mm_dtype, approx_recip):
    r = block_b * seq
    x = x_ref[...].reshape(r, E)                       # f32 residual

    # --- QKV projection (wqkv pre-transposed (E,3E); Q columns pre-scaled by
    #     1/sqrt(D)); matmul inputs in mm_dtype, accumulation in f32; result
    #     parked in VMEM scratch to bound live ranges across the head loop.
    qkv_ref[...] = jnp.dot(x.astype(mm_dtype), wqkv_ref[...],
                           preferred_element_type=jnp.float32) + bqkv_ref[0]

    # --- per-head attention; ctx staged into (r, E) scratch at lane offset h*D
    for h in range(H):                                   # static unroll (H=8)
        q = qkv_ref[:, h * D:(h + 1) * D]
        k = qkv_ref[:, E + h * D:E + (h + 1) * D]
        v = qkv_ref[:, 2 * E + h * D:2 * E + (h + 1) * D]
        if block_b == 1:
            sc = lax.dot_general(q.astype(mm_dtype), k.astype(mm_dtype),
                                 (((1,), (1,)), ((), ())),
                                 preferred_element_type=jnp.float32)   # (S,S)
            sc = sc - jnp.max(sc, axis=-1, keepdims=True)
            p = jnp.exp(sc)
            p = p * pl.reciprocal(jnp.sum(p, axis=-1, keepdims=True),
                                  approx=approx_recip)
            ctx = jnp.dot(p.astype(mm_dtype), v.astype(mm_dtype),
                          preferred_element_type=jnp.float32)          # (S,D)
        else:
            q3 = q.reshape(block_b, seq, D).astype(mm_dtype)
            k3 = k.reshape(block_b, seq, D).astype(mm_dtype)
            v3 = v.reshape(block_b, seq, D).astype(mm_dtype)
            sc = lax.dot_general(q3, k3, (((2,), (2,)), ((0,), (0,))),
                                 preferred_element_type=jnp.float32)   # (Bt,S,S)
            sc = sc - jnp.max(sc, axis=-1, keepdims=True)
            p = jnp.exp(sc)
            p = p * pl.reciprocal(jnp.sum(p, axis=-1, keepdims=True),
                                  approx=approx_recip)
            ctx = lax.dot_general(p.astype(mm_dtype), v3,
                                  (((2,), (1,)), ((0,), (0,))),
                                  preferred_element_type=jnp.float32)  # (Bt,S,D)
            ctx = ctx.reshape(r, D)
        ctx_ref[:, h * D:(h + 1) * D] = ctx

    # --- single (r,128)x(128,128) output projection (un-folded) -------------
    attn = jnp.dot(ctx_ref[...].astype(mm_dtype), wo_ref[...],
                   preferred_element_type=jnp.float32) + bo_ref[0]

    # TODO(synk): dropout1/2/3 are identity here (inference mode).
    out = attn + x
    out = _layernorm(out, g1_ref[0], be1_ref[0])

    # --- feed-forward (weights pre-transposed) ------------------------------
    res = out
    hdn = jnp.dot(out.astype(mm_dtype), w1_ref[...],
                  preferred_element_type=jnp.float32) + b1_ref[0]
    hdn = jnp.maximum(hdn, 0.0)                                         # relu
    out = jnp.dot(hdn.astype(mm_dtype), w2_ref[...],
                  preferred_element_type=jnp.float32) + b2_ref[0]
    out = out + res
    out = _layernorm(out, g2_ref[0], be2_ref[0])

    o_ref[...] = out.reshape(block_b, seq, E)


def _is_multi_tensorcore():
    """True for chips whose TensorCores are fed by splitting the grid (v7x)."""
    # TODO(synk): switch to pltpu.get_tpu_info() chip-version query when stable.
    try:
        kind = jax.local_devices()[0].device_kind.lower()
    except Exception:
        return False
    return "v7" in kind


def _choose_block_b(B, S, multi_tc):
    # Target 512-1024 rows of matmul M per grid step (amortizes ~0.35us/step
    # and fills the MXU), but cap by the per-step (block_b,H,S,S) f32 score
    # footprint and by batched-matmul unroll size.
    bb = max(1, min(B, 1024 // max(S, 1)))
    score_bytes = H * S * S * 4
    bb = min(bb, max(1, (8 * 1024 * 1024) // max(score_bytes, 1)))
    bb = min(bb, 64)
    if multi_tc and B >= 2 and (B // bb) < 2:
        bb = max(1, min(bb, B // 2))       # keep >=2 "parallel" steps (2 TCs)
    while B % bb:                          # must divide B evenly
        bb -= 1
    return bb


def selfattn_layer(x, params, block_b=None, mm_dtype=jnp.bfloat16):
    """x: (B, S, 128) float32 -> (B, S, 128) float32."""
    B, S, _ = x.shape
    # TODO(synk): pad S to a multiple of 8 (16 for bf16 inputs) instead of
    # asserting, with attention masking for the padded keys.
    assert S % 8 == 0, "sequence length must be a multiple of 8"

    (wqkv, bqkv, wo, bo, w1, b1, w2, b2, g1, be1, g2, be2) = params

    # ---- one-time host-side weight re-packing (no in-kernel transposes) ----
    scale = 1.0 / float(np.sqrt(D))
    wqkv_t = wqkv.T                                   # (E, 3E)
    wqkv_t = wqkv_t.at[:, :E].multiply(scale)         # fold 1/sqrt(D) into Q
    bqkv_s = bqkv.at[:, :E].multiply(scale)
    wo_t = wo.T                                       # (E, E)
    w1_t = w1.T                                       # (E, FF)
    w2_t = w2.T                                       # (FF, E)
    if mm_dtype != jnp.float32:                       # bf16 matmul operands
        wqkv_t = wqkv_t.astype(mm_dtype)
        wo_t = wo_t.astype(mm_dtype)
        w1_t = w1_t.astype(mm_dtype)
        w2_t = w2_t.astype(mm_dtype)
    packed = (wqkv_t, bqkv_s, wo_t, bo, w1_t, b1, w2_t, b2,
              g1, be1, g2, be2)

    # ---- choose how many batch elements each grid step processes -----------
    if block_b is None:
        block_b = _choose_block_b(B, S, _is_multi_tensorcore())
    while B % block_b:
        block_b -= 1
    grid = (B // block_b,)
    r = block_b * S

    def wspec(a):
        nd = a.ndim
        return pl.BlockSpec(a.shape, lambda i, _nd=nd: (0,) * _nd)

    kernel = functools.partial(
        selfattn_kernel, block_b=block_b, seq=S, mm_dtype=mm_dtype,
        approx_recip=(mm_dtype != jnp.float32))

    return pl.pallas_call(
        kernel,
        out_shape=jax.ShapeDtypeStruct((B, S, E), jnp.float32),
        grid_spec=pltpu.PrefetchScalarGridSpec(
            num_scalar_prefetch=0,
            grid=grid,
            in_specs=[pl.BlockSpec((block_b, S, E), lambda i: (i, 0, 0))]
                     + [wspec(a) for a in packed],
            out_specs=pl.BlockSpec((block_b, S, E), lambda i: (i, 0, 0)),
            scratch_shapes=[pltpu.VMEM((r, 3 * E), jnp.float32),   # qkv
                            pltpu.VMEM((r, E), jnp.float32)]),     # ctx heads
        compiler_params=pltpu.CompilerParams(
            dimension_semantics=("parallel",),
            vmem_limit_bytes=48 * 1024 * 1024),
    )(x, *packed)


# ------------------------- pure-JAX reference ----------------------------
def ref_forward(x, params):
    (wqkv, bqkv, wo, bo, w1, b1, w2, b2, g1, be1, g2, be2) = params
    B, S, _ = x.shape
    qkv = x @ wqkv.T + bqkv[0]
    q, k, v = qkv[..., :E], qkv[..., E:2 * E], qkv[..., 2 * E:]
    qh = q.reshape(B, S, H, D).transpose(0, 2, 1, 3) / (D ** 0.5)
    kh = k.reshape(B, S, H, D).transpose(0, 2, 1, 3)
    vh = v.reshape(B, S, H, D).transpose(0, 2, 1, 3)
    s = jnp.einsum("bhqd,bhkd->bhqk", qh, kh)
    p = jax.nn.softmax(s, axis=-1)
    ctx = jnp.einsum("bhqk,bhkd->bhqd", p, vh).transpose(0, 2, 1, 3).reshape(B, S, E)
    attn = ctx @ wo.T + bo[0]
    out = attn + x
    out = _layernorm(out, g1[0], be1[0])
    res = out
    hdn = jax.nn.relu(out @ w1.T + b1[0])
    out = hdn @ w2.T + b2[0] + res
    out = _layernorm(out, g2[0], be2[0])
    return out


# ------------------------------ main --------------------------------------
if __name__ == "__main__":
    key = jax.random.PRNGKey(0)
    ks = jax.random.split(key, 16)

    B, S = 2, 8
    x = jax.random.normal(ks[0], (B, S, E), dtype=jnp.float32)

    def init(k, shape, scale=0.05):
        return scale * jax.random.normal(k, shape, dtype=jnp.float32)

    params = (
        init(ks[1], (3 * E, E)),          # in_proj_weight
        init(ks[2], (1, 3 * E)),          # in_proj_bias
        init(ks[3], (E, E)),              # out_proj.weight
        init(ks[4], (1, E)),              # out_proj.bias
        init(ks[5], (FF, E)),             # linear1.weight
        init(ks[6], (1, FF)),             # linear1.bias
        init(ks[7], (E, FF)),             # linear2.weight
        init(ks[8], (1, E)),              # linear2.bias
        jnp.ones((1, E), jnp.float32),    # norm1.weight
        jnp.zeros((1, E), jnp.float32),   # norm1.bias
        jnp.ones((1, E), jnp.float32),    # norm2.weight
        jnp.zeros((1, E), jnp.float32),   # norm2.bias
    )

    ref = jax.block_until_ready(ref_forward(x, params))

    # exact variant: f32 matmuls, tight tolerance (semantic check)
    out_f32 = jax.block_until_ready(
        selfattn_layer(x, params, mm_dtype=jnp.float32))
    assert out_f32.shape == (B, S, E), out_f32.shape
    assert np.allclose(np.asarray(out_f32), np.asarray(ref),
                       atol=1e-4, rtol=1e-4), \
        float(np.max(np.abs(np.asarray(out_f32) - np.asarray(ref))))

    # fast variant (default): bf16 matmul inputs / f32 accumulation, loose tol
    out_bf16 = jax.block_until_ready(
        selfattn_layer(x, params, mm_dtype=jnp.bfloat16))
    assert out_bf16.shape == (B, S, E), out_bf16.shape
    assert np.allclose(np.asarray(out_bf16), np.asarray(ref),
                       atol=5e-2, rtol=5e-2), \
        float(np.max(np.abs(np.asarray(out_bf16) - np.asarray(ref))))

    print("KERNEL_OK")
</pallas_src>

<mosaic_0001>
module attributes {stable_mosaic.version = 11 : i64} {
  func.func @selfattn_kernel(%arg0: i32, %arg1: memref<2x8x128xf32, #tpu.memory_space<vmem>>, %arg2: memref<128x384xf32, #tpu.memory_space<vmem>>, %arg3: memref<1x384xf32, #tpu.memory_space<vmem>>, %arg4: memref<128x128xf32, #tpu.memory_space<vmem>>, %arg5: memref<1x128xf32, #tpu.memory_space<vmem>>, %arg6: memref<128x512xf32, #tpu.memory_space<vmem>>, %arg7: memref<1x512xf32, #tpu.memory_space<vmem>>, %arg8: memref<512x128xf32, #tpu.memory_space<vmem>>, %arg9: memref<1x128xf32, #tpu.memory_space<vmem>>, %arg10: memref<1x128xf32, #tpu.memory_space<vmem>>, %arg11: memref<1x128xf32, #tpu.memory_space<vmem>>, %arg12: memref<1x128xf32, #tpu.memory_space<vmem>>, %arg13: memref<1x128xf32, #tpu.memory_space<vmem>>, %arg14: memref<2x8x128xf32, #tpu.memory_space<vmem>>, %arg15: memref<16x384xf32, #tpu.memory_space<vmem>>, %arg16: memref<16x128xf32, #tpu.memory_space<vmem>>) attributes {dimension_semantics = [#tpu.dimension_semantics<parallel>], iteration_bounds = array<i64: 1>, scalar_prefetch = 0 : i64, scratch_operands = 2 : i64, tpu.core_type = #tpu.core_type<tc>, window_params = [{transform_indices = @transform_0, window_bounds = array<i64: 2, 8, 128>}, {pipeline_mode = #tpu.pipeline_mode<synchronous>, transform_indices = @transform_1, window_bounds = array<i64: 128, 384>}, {pipeline_mode = #tpu.pipeline_mode<synchronous>, transform_indices = @transform_2, window_bounds = array<i64: 1, 384>}, {pipeline_mode = #tpu.pipeline_mode<synchronous>, transform_indices = @transform_3, window_bounds = array<i64: 128, 128>}, {pipeline_mode = #tpu.pipeline_mode<synchronous>, transform_indices = @transform_4, window_bounds = array<i64: 1, 128>}, {pipeline_mode = #tpu.pipeline_mode<synchronous>, transform_indices = @transform_5, window_bounds = array<i64: 128, 512>}, {pipeline_mode = #tpu.pipeline_mode<synchronous>, transform_indices = @transform_6, window_bounds = array<i64: 1, 512>}, {pipeline_mode = #tpu.pipeline_mode<synchronous>, transform_indices = @transform_7, window_bounds = array<i64: 512, 128>}, {pipeline_mode = #tpu.pipeline_mode<synchronous>, transform_indices = @transform_8, window_bounds = array<i64: 1, 128>}, {pipeline_mode = #tpu.pipeline_mode<synchronous>, transform_indices = @transform_9, window_bounds = array<i64: 1, 128>}, {pipeline_mode = #tpu.pipeline_mode<synchronous>, transform_indices = @transform_10, window_bounds = array<i64: 1, 128>}, {pipeline_mode = #tpu.pipeline_mode<synchronous>, transform_indices = @transform_11, window_bounds = array<i64: 1, 128>}, {pipeline_mode = #tpu.pipeline_mode<synchronous>, transform_indices = @transform_12, window_bounds = array<i64: 1, 128>}, {transform_indices = @transform_13, window_bounds = array<i64: 2, 8, 128>}]} {
    %c0 = arith.constant 0 : index
    %c0_0 = arith.constant 0 : index
    %c0_1 = arith.constant 0 : index
    %0 = vector.load %arg1[%c0, %c0_0, %c0_1] : memref<2x8x128xf32, #tpu.memory_space<vmem>>, vector<2x8x128xf32>
    %1 = vector.shape_cast %0 : vector<2x8x128xf32> to vector<16x128xf32>
    %c0_2 = arith.constant 0 : index
    %c0_3 = arith.constant 0 : index
    %2 = vector.load %arg2[%c0_2, %c0_3] : memref<128x384xf32, #tpu.memory_space<vmem>>, vector<128x384xf32>
    %cst = arith.constant dense<0.000000e+00> : vector<16x384xf32>
    %3 = tpu.matmul %1, %2, %cst {dimension_numbers = #tpu.dot_dimension_numbers<[1], [0], [0], [1], [0, 0, 1, 1], [], []>} : vector<16x128xf32>, vector<128x384xf32>, vector<16x384xf32> -> vector<16x384xf32>
    %c0_4 = arith.constant 0 : index
    %c0_5 = arith.constant 0 : index
    %4 = vector.load %arg3[%c0_4, %c0_5] : memref<1x384xf32, #tpu.memory_space<vmem>>, vector<1x384xf32>
    %5 = vector.shape_cast %4 : vector<1x384xf32> to vector<384xf32>
    %6 = vector.shape_cast %5 : vector<384xf32> to vector<1x384xf32>
    %7 = vector.broadcast %6 : vector<1x384xf32> to vector<16x384xf32>
    %8 = arith.addf %3, %7 : vector<16x384xf32>
    %c0_6 = arith.constant 0 : index
    %c0_7 = arith.constant 0 : index
    %9 = vector.load %arg15[%c0_6, %c0_7] : memref<16x384xf32, #tpu.memory_space<vmem>>, vector<16x384xf32>
    tpu.vector_store %arg15[%c0_6, %c0_7], %8 {strides = array<i32>} : memref<16x384xf32, #tpu.memory_space<vmem>>, vector<16x384xf32>,
    %c0_8 = arith.constant 0 : index
    %c0_9 = arith.constant 0 : index
    %10 = vector.load %arg15[%c0_8, %c0_9] : memref<16x384xf32, #tpu.memory_space<vmem>>, vector<16x16xf32>
    %c0_10 = arith.constant 0 : index
    %c128 = arith.constant 128 : index
    %11 = vector.load %arg15[%c0_10, %c128] : memref<16x384xf32, #tpu.memory_space<vmem>>, vector<16x16xf32>
    %c0_11 = arith.constant 0 : index
    %c256 = arith.constant 256 : index
    %12 = vector.load %arg15[%c0_11, %c256] : memref<16x384xf32, #tpu.memory_space<vmem>>, vector<16x16xf32>
    %13 = vector.shape_cast %10 : vector<16x16xf32> to vector<2x8x16xf32>
    %14 = vector.shape_cast %11 : vector<16x16xf32> to vector<2x8x16xf32>
    %15 = vector.shape_cast %12 : vector<16x16xf32> to vector<2x8x16xf32>
    %cst_12 = arith.constant dense<0.000000e+00> : vector<2x8x8xf32>
    %16 = tpu.matmul %13, %14, %cst_12 {dimension_numbers = #tpu.dot_dimension_numbers<[2], [2], [1], [1], [0, 0, 0, 1, 1, 1], [0], [0]>} : vector<2x8x16xf32>, vector<2x8x16xf32>, vector<2x8x8xf32> -> vector<2x8x8xf32>
    %cst_13 = arith.constant dense<0xFF800000> : vector<2x8xf32>
    %17 = vector.multi_reduction <maximumf>, %16, %cst_13 [2] : vector<2x8x8xf32> to vector<2x8xf32>
    %18 = vector.shape_cast %17 : vector<2x8xf32> to vector<2x8x1xf32>
    %19 = vector.broadcast %18 : vector<2x8x1xf32> to vector<2x8x8xf32>
    %20 = arith.subf %16, %19 : vector<2x8x8xf32>
    %21 = math.exp %20 : vector<2x8x8xf32>
    %cst_14 = arith.constant dense<0.000000e+00> : vector<2x8xf32>
    %22 = vector.multi_reduction <add>, %21, %cst_14 [2] : vector<2x8x8xf32> to vector<2x8xf32>
    %23 = vector.shape_cast %22 : vector<2x8xf32> to vector<2x8x1xf32>
    %24 = tpu.reciprocal %23 : vector<2x8x1xf32> -> vector<2x8x1xf32>
    %25 = vector.broadcast %24 : vector<2x8x1xf32> to vector<2x8x8xf32>
    %26 = arith.mulf %21, %25 : vector<2x8x8xf32>
    %cst_15 = arith.constant dense<0.000000e+00> : vector<2x8x16xf32>
    %27 = tpu.matmul %26, %15, %cst_15 {dimension_numbers = #tpu.dot_dimension_numbers<[2], [1], [1], [2], [0, 0, 0, 1, 1, 2], [0], [0]>} : vector<2x8x8xf32>, vector<2x8x16xf32>, vector<2x8x16xf32> -> vector<2x8x16xf32>
    %28 = vector.shape_cast %27 : vector<2x8x16xf32> to vector<16x16xf32>
    %c0_16 = arith.constant 0 : index
    %c0_17 = arith.constant 0 : index
    %29 = vector.load %arg16[%c0_16, %c0_17] : memref<16x128xf32, #tpu.memory_space<vmem>>, vector<16x16xf32>
    tpu.vector_store %arg16[%c0_16, %c0_17], %28 {strides = array<i32>} : memref<16x128xf32, #tpu.memory_space<vmem>>, vector<16x16xf32>,
    %c0_18 = arith.constant 0 : index
    %c16 = arith.constant 16 : index
    %30 = vector.load %arg15[%c0_18, %c16] : memref<16x384xf32, #tpu.memory_space<vmem>>, vector<16x16xf32>
    %c0_19 = arith.constant 0 : index
    %c144 = arith.constant 144 : index
    %31 = vector.load %arg15[%c0_19, %c144] : memref<16x384xf32, #tpu.memory_space<vmem>>, vector<16x16xf32>
    %c0_20 = arith.constant 0 : index
    %c272 = arith.constant 272 : index
    %32 = vector.load %arg15[%c0_20, %c272] : memref<16x384xf32, #tpu.memory_space<vmem>>, vector<16x16xf32>
    %33 = vector.shape_cast %30 : vector<16x16xf32> to vector<2x8x16xf32>
    %34 = vector.shape_cast %31 : vector<16x16xf32> to vector<2x8x16xf32>
    %35 = vector.shape_cast %32 : vector<16x16xf32> to vector<2x8x16xf32>
    %cst_21 = arith.constant dense<0.000000e+00> : vector<2x8x8xf32>
    %36 = tpu.matmul %33, %34, %cst_21 {dimension_numbers = #tpu.dot_dimension_numbers<[2], [2], [1], [1], [0, 0, 0, 1, 1, 1], [0], [0]>} : vector<2x8x16xf32>, vector<2x8x16xf32>, vector<2x8x8xf32> -> vector<2x8x8xf32>
    %cst_22 = arith.constant dense<0xFF800000> : vector<2x8xf32>
    %37 = vector.multi_reduction <maximumf>, %36, %cst_22 [2] : vector<2x8x8xf32> to vector<2x8xf32>
    %38 = vector.shape_cast %37 : vector<2x8xf32> to vector<2x8x1xf32>
    %39 = vector.broadcast %38 : vector<2x8x1xf32> to vector<2x8x8xf32>
    %40 = arith.subf %36, %39 : vector<2x8x8xf32>
    %41 = math.exp %40 : vector<2x8x8xf32>
    %cst_23 = arith.constant dense<0.000000e+00> : vector<2x8xf32>
    %42 = vector.multi_reduction <add>, %41, %cst_23 [2] : vector<2x8x8xf32> to vector<2x8xf32>
    %43 = vector.shape_cast %42 : vector<2x8xf32> to vector<2x8x1xf32>
    %44 = tpu.reciprocal %43 : vector<2x8x1xf32> -> vector<2x8x1xf32>
    %45 = vector.broadcast %44 : vector<2x8x1xf32> to vector<2x8x8xf32>
    %46 = arith.mulf %41, %45 : vector<2x8x8xf32>
    %cst_24 = arith.constant dense<0.000000e+00> : vector<2x8x16xf32>
    %47 = tpu.matmul %46, %35, %cst_24 {dimension_numbers = #tpu.dot_dimension_numbers<[2], [1], [1], [2], [0, 0, 0, 1, 1, 2], [0], [0]>} : vector<2x8x8xf32>, vector<2x8x16xf32>, vector<2x8x16xf32> -> vector<2x8x16xf32>
    %48 = vector.shape_cast %47 : vector<2x8x16xf32> to vector<16x16xf32>
    %c0_25 = arith.constant 0 : index
    %c16_26 = arith.constant 16 : index
    %49 = vector.load %arg16[%c0_25, %c16_26] : memref<16x128xf32, #tpu.memory_space<vmem>>, vector<16x16xf32>
    tpu.vector_store %arg16[%c0_25, %c16_26], %48 {strides = array<i32>} : memref<16x128xf32, #tpu.memory_space<vmem>>, vector<16x16xf32>,
    %c0_27 = arith.constant 0 : index
    %c32 = arith.constant 32 : index
    %50 = vector.load %arg15[%c0_27, %c32] : memref<16x384xf32, #tpu.memory_space<vmem>>, vector<16x16xf32>
    %c0_28 = arith.constant 0 : index
    %c160 = arith.constant 160 : index
    %51 = vector.load %arg15[%c0_28, %c160] : memref<16x384xf32, #tpu.memory_space<vmem>>, vector<16x16xf32>
    %c0_29 = arith.constant 0 : index
    %c288 = arith.constant 288 : index
    %52 = vector.load %arg15[%c0_29, %c288] : memref<16x384xf32, #tpu.memory_space<vmem>>, vector<16x16xf32>
    %53 = vector.shape_cast %50 : vector<16x16xf32> to vector<2x8x16xf32>
    %54 = vector.shape_cast %51 : vector<16x16xf32> to vector<2x8x16xf32>
    %55 = vector.shape_cast %52 : vector<16x16xf32> to vector<2x8x16xf32>
    %cst_30 = arith.constant dense<0.000000e+00> : vector<2x8x8xf32>
    %56 = tpu.matmul %53, %54, %cst_30 {dimension_numbers = #tpu.dot_dimension_numbers<[2], [2], [1], [1], [0, 0, 0, 1, 1, 1], [0], [0]>} : vector<2x8x16xf32>, vector<2x8x16xf32>, vector<2x8x8xf32> -> vector<2x8x8xf32>
    %cst_31 = arith.constant dense<0xFF800000> : vector<2x8xf32>
    %57 = vector.multi_reduction <maximumf>, %56, %cst_31 [2] : vector<2x8x8xf32> to vector<2x8xf32>
    %58 = vector.shape_cast %57 : vector<2x8xf32> to vector<2x8x1xf32>
    %59 = vector.broadcast %58 : vector<2x8x1xf32> to vector<2x8x8xf32>
    %60 = arith.subf %56, %59 : vector<2x8x8xf32>
    %61 = math.exp %60 : vector<2x8x8xf32>
    %cst_32 = arith.constant dense<0.000000e+00> : vector<2x8xf32>
    %62 = vector.multi_reduction <add>, %61, %cst_32 [2] : vector<2x8x8xf32> to vector<2x8xf32>
    %63 = vector.shape_cast %62 : vector<2x8xf32> to vector<2x8x1xf32>
    %64 = tpu.reciprocal %63 : vector<2x8x1xf32> -> vector<2x8x1xf32>
    %65 = vector.broadcast %64 : vector<2x8x1xf32> to vector<2x8x8xf32>
    %66 = arith.mulf %61, %65 : vector<2x8x8xf32>
    %cst_33 = arith.constant dense<0.000000e+00> : vector<2x8x16xf32>
    %67 = tpu.matmul %66, %55, %cst_33 {dimension_numbers = #tpu.dot_dimension_numbers<[2], [1], [1], [2], [0, 0, 0, 1, 1, 2], [0], [0]>} : vector<2x8x8xf32>, vector<2x8x16xf32>, vector<2x8x16xf32> -> vector<2x8x16xf32>
    %68 = vector.shape_cast %67 : vector<2x8x16xf32> to vector<16x16xf32>
    %c0_34 = arith.constant 0 : index
    %c32_35 = arith.constant 32 : index
    %69 = vector.load %arg16[%c0_34, %c32_35] : memref<16x128xf32, #tpu.memory_space<vmem>>, vector<16x16xf32>
    tpu.vector_store %arg16[%c0_34, %c32_35], %68 {strides = array<i32>} : memref<16x128xf32, #tpu.memory_space<vmem>>, vector<16x16xf32>,
    %c0_36 = arith.constant 0 : index
    %c48 = arith.constant 48 : index
    %70 = vector.load %arg15[%c0_36, %c48] : memref<16x384xf32, #tpu.memory_space<vmem>>, vector<16x16xf32>
    %c0_37 = arith.constant 0 : index
    %c176 = arith.constant 176 : index
    %71 = vector.load %arg15[%c0_37, %c176] : memref<16x384xf32, #tpu.memory_space<vmem>>, vector<16x16xf32>
    %c0_38 = arith.constant 0 : index
    %c304 = arith.constant 304 : index
    %72 = vector.load %arg15[%c0_38, %c304] : memref<16x384xf32, #tpu.memory_space<vmem>>, vector<16x16xf32>
    %73 = vector.shape_cast %70 : vector<16x16xf32> to vector<2x8x16xf32>
    %74 = vector.shape_cast %71 : vector<16x16xf32> to vector<2x8x16xf32>
    %75 = vector.shape_cast %72 : vector<16x16xf32> to vector<2x8x16xf32>
    %cst_39 = arith.constant dense<0.000000e+00> : vector<2x8x8xf32>
    %76 = tpu.matmul %73, %74, %cst_39 {dimension_numbers = #tpu.dot_dimension_numbers<[2], [2], [1], [1], [0, 0, 0, 1, 1, 1], [0], [0]>} : vector<2x8x16xf32>, vector<2x8x16xf32>, vector<2x8x8xf32> -> vector<2x8x8xf32>
    %cst_40 = arith.constant dense<0xFF800000> : vector<2x8xf32>
    %77 = vector.multi_reduction <maximumf>, %76, %cst_40 [2] : vector<2x8x8xf32> to vector<2x8xf32>
    %78 = vector.shape_cast %77 : vector<2x8xf32> to vector<2x8x1xf32>
    %79 = vector.broadcast %78 : vector<2x8x1xf32> to vector<2x8x8xf32>
    %80 = arith.subf %76, %79 : vector<2x8x8xf32>
    %81 = math.exp %80 : vector<2x8x8xf32>
    %cst_41 = arith.constant dense<0.000000e+00> : vector<2x8xf32>
    %82 = vector.multi_reduction <add>, %81, %cst_41 [2] : vector<2x8x8xf32> to vector<2x8xf32>
    %83 = vector.shape_cast %82 : vector<2x8xf32> to vector<2x8x1xf32>
    %84 = tpu.reciprocal %83 : vector<2x8x1xf32> -> vector<2x8x1xf32>
    %85 = vector.broadcast %84 : vector<2x8x1xf32> to vector<2x8x8xf32>
    %86 = arith.mulf %81, %85 : vector<2x8x8xf32>
    %cst_42 = arith.constant dense<0.000000e+00> : vector<2x8x16xf32>
    %87 = tpu.matmul %86, %75, %cst_42 {dimension_numbers = #tpu.dot_dimension_numbers<[2], [1], [1], [2], [0, 0, 0, 1, 1, 2], [0], [0]>} : vector<2x8x8xf32>, vector<2x8x16xf32>, vector<2x8x16xf32> -> vector<2x8x16xf32>
    %88 = vector.shape_cast %87 : vector<2x8x16xf32> to vector<16x16xf32>
    %c0_43 = arith.constant 0 : index
    %c48_44 = arith.constant 48 : index
    %89 = vector.load %arg16[%c0_43, %c48_44] : memref<16x128xf32, #tpu.memory_space<vmem>>, vector<16x16xf32>
    tpu.vector_store %arg16[%c0_43, %c48_44], %88 {strides = array<i32>} : memref<16x128xf32, #tpu.memory_space<vmem>>, vector<16x16xf32>,
    %c0_45 = arith.constant 0 : index
    %c64 = arith.constant 64 : index
    %90 = vector.load %arg15[%c0_45, %c64] : memref<16x384xf32, #tpu.memory_space<vmem>>, vector<16x16xf32>
    %c0_46 = arith.constant 0 : index
    %c192 = arith.constant 192 : index
    %91 = vector.load %arg15[%c0_46, %c192] : memref<16x384xf32, #tpu.memory_space<vmem>>, vector<16x16xf32>
    %c0_47 = arith.constant 0 : index
    %c320 = arith.constant 320 : index
    %92 = vector.load %arg15[%c0_47, %c320] : memref<16x384xf32, #tpu.memory_space<vmem>>, vector<16x16xf32>
    %93 = vector.shape_cast %90 : vector<16x16xf32> to vector<2x8x16xf32>
    %94 = vector.shape_cast %91 : vector<16x16xf32> to vector<2x8x16xf32>
    %95 = vector.shape_cast %92 : vector<16x16xf32> to vector<2x8x16xf32>
    %cst_48 = arith.constant dense<0.000000e+00> : vector<2x8x8xf32>
    %96 = tpu.matmul %93, %94, %cst_48 {dimension_numbers = #tpu.dot_dimension_numbers<[2], [2], [1], [1], [0, 0, 0, 1, 1, 1], [0], [0]>} : vector<2x8x16xf32>, vector<2x8x16xf32>, vector<2x8x8xf32> -> vector<2x8x8xf32>
    %cst_49 = arith.constant dense<0xFF800000> : vector<2x8xf32>
    %97 = vector.multi_reduction <maximumf>, %96, %cst_49 [2] : vector<2x8x8xf32> to vector<2x8xf32>
    %98 = vector.shape_cast %97 : vector<2x8xf32> to vector<2x8x1xf32>
    %99 = vector.broadcast %98 : vector<2x8x1xf32> to vector<2x8x8xf32>
    %100 = arith.subf %96, %99 : vector<2x8x8xf32>
    %101 = math.exp %100 : vector<2x8x8xf32>
    %cst_50 = arith.constant dense<0.000000e+00> : vector<2x8xf32>
    %102 = vector.multi_reduction <add>, %101, %cst_50 [2] : vector<2x8x8xf32> to vector<2x8xf32>
    %103 = vector.shape_cast %102 : vector<2x8xf32> to vector<2x8x1xf32>
    %104 = tpu.reciprocal %103 : vector<2x8x1xf32> -> vector<2x8x1xf32>
    %105 = vector.broadcast %104 : vector<2x8x1xf32> to vector<2x8x8xf32>
    %106 = arith.mulf %101, %105 : vector<2x8x8xf32>
    %cst_51 = arith.constant dense<0.000000e+00> : vector<2x8x16xf32>
    %107 = tpu.matmul %106, %95, %cst_51 {dimension_numbers = #tpu.dot_dimension_numbers<[2], [1], [1], [2], [0, 0, 0, 1, 1, 2], [0], [0]>} : vector<2x8x8xf32>, vector<2x8x16xf32>, vector<2x8x16xf32> -> vector<2x8x16xf32>
    %108 = vector.shape_cast %107 : vector<2x8x16xf32> to vector<16x16xf32>
    %c0_52 = arith.constant 0 : index
    %c64_53 = arith.constant 64 : index
    %109 = vector.load %arg16[%c0_52, %c64_53] : memref<16x128xf32, #tpu.memory_space<vmem>>, vector<16x16xf32>
    tpu.vector_store %arg16[%c0_52, %c64_53], %108 {strides = array<i32>} : memref<16x128xf32, #tpu.memory_space<vmem>>, vector<16x16xf32>,
    %c0_54 = arith.constant 0 : index
    %c80 = arith.constant 80 : index
    %110 = vector.load %arg15[%c0_54, %c80] : memref<16x384xf32, #tpu.memory_space<vmem>>, vector<16x16xf32>
    %c0_55 = arith.constant 0 : index
    %c208 = arith.constant 208 : index
    %111 = vector.load %arg15[%c0_55, %c208] : memref<16x384xf32, #tpu.memory_space<vmem>>, vector<16x16xf32>
    %c0_56 = arith.constant 0 : index
    %c336 = arith.constant 336 : index
    %112 = vector.load %arg15[%c0_56, %c336] : memref<16x384xf32, #tpu.memory_space<vmem>>, vector<16x16xf32>
    %113 = vector.shape_cast %110 : vector<16x16xf32> to vector<2x8x16xf32>
    %114 = vector.shape_cast %111 : vector<16x16xf32> to vector<2x8x16xf32>
    %115 = vector.shape_cast %112 : vector<16x16xf32> to vector<2x8x16xf32>
    %cst_57 = arith.constant dense<0.000000e+00> : vector<2x8x8xf32>
    %116 = tpu.matmul %113, %114, %cst_57 {dimension_numbers = #tpu.dot_dimension_numbers<[2], [2], [1], [1], [0, 0, 0, 1, 1, 1], [0], [0]>} : vector<2x8x16xf32>, vector<2x8x16xf32>, vector<2x8x8xf32> -> vector<2x8x8xf32>
    %cst_58 = arith.constant dense<0xFF800000> : vector<2x8xf32>
    %117 = vector.multi_reduction <maximumf>, %116, %cst_58 [2] : vector<2x8x8xf32> to vector<2x8xf32>
    %118 = vector.shape_cast %117 : vector<2x8xf32> to vector<2x8x1xf32>
    %119 = vector.broadcast %118 : vector<2x8x1xf32> to vector<2x8x8xf32>
    %120 = arith.subf %116, %119 : vector<2x8x8xf32>
    %121 = math.exp %120 : vector<2x8x8xf32>
    %cst_59 = arith.constant dense<0.000000e+00> : vector<2x8xf32>
    %122 = vector.multi_reduction <add>, %121, %cst_59 [2] : vector<2x8x8xf32> to vector<2x8xf32>
    %123 = vector.shape_cast %122 : vector<2x8xf32> to vector<2x8x1xf32>
    %124 = tpu.reciprocal %123 : vector<2x8x1xf32> -> vector<2x8x1xf32>
    %125 = vector.broadcast %124 : vector<2x8x1xf32> to vector<2x8x8xf32>
    %126 = arith.mulf %121, %125 : vector<2x8x8xf32>
    %cst_60 = arith.constant dense<0.000000e+00> : vector<2x8x16xf32>
    %127 = tpu.matmul %126, %115, %cst_60 {dimension_numbers = #tpu.dot_dimension_numbers<[2], [1], [1], [2], [0, 0, 0, 1, 1, 2], [0], [0]>} : vector<2x8x8xf32>, vector<2x8x16xf32>, vector<2x8x16xf32> -> vector<2x8x16xf32>
    %128 = vector.shape_cast %127 : vector<2x8x16xf32> to vector<16x16xf32>
    %c0_61 = arith.constant 0 : index
    %c80_62 = arith.constant 80 : index
    %129 = vector.load %arg16[%c0_61, %c80_62] : memref<16x128xf32, #tpu.memory_space<vmem>>, vector<16x16xf32>
    tpu.vector_store %arg16[%c0_61, %c80_62], %128 {strides = array<i32>} : memref<16x128xf32, #tpu.memory_space<vmem>>, vector<16x16xf32>,
    %c0_63 = arith.constant 0 : index
    %c96 = arith.constant 96 : index
    %130 = vector.load %arg15[%c0_63, %c96] : memref<16x384xf32, #tpu.memory_space<vmem>>, vector<16x16xf32>
    %c0_64 = arith.constant 0 : index
    %c224 = arith.constant 224 : index
    %131 = vector.load %arg15[%c0_64, %c224] : memref<16x384xf32, #tpu.memory_space<vmem>>, vector<16x16xf32>
    %c0_65 = arith.constant 0 : index
    %c352 = arith.constant 352 : index
    %132 = vector.load %arg15[%c0_65, %c352] : memref<16x384xf32, #tpu.memory_space<vmem>>, vector<16x16xf32>
    %133 = vector.shape_cast %130 : vector<16x16xf32> to vector<2x8x16xf32>
    %134 = vector.shape_cast %131 : vector<16x16xf32> to vector<2x8x16xf32>
    %135 = vector.shape_cast %132 : vector<16x16xf32> to vector<2x8x16xf32>
    %cst_66 = arith.constant dense<0.000000e+00> : vector<2x8x8xf32>
    %136 = tpu.matmul %133, %134, %cst_66 {dimension_numbers = #tpu.dot_dimension_numbers<[2], [2], [1], [1], [0, 0, 0, 1, 1, 1], [0], [0]>} : vector<2x8x16xf32>, vector<2x8x16xf32>, vector<2x8x8xf32> -> vector<2x8x8xf32>
    %cst_67 = arith.constant dense<0xFF800000> : vector<2x8xf32>
    %137 = vector.multi_reduction <maximumf>, %136, %cst_67 [2] : vector<2x8x8xf32> to vector<2x8xf32>
    %138 = vector.shape_cast %137 : vector<2x8xf32> to vector<2x8x1xf32>
    %139 = vector.broadcast %138 : vector<2x8x1xf32> to vector<2x8x8xf32>
    %140 = arith.subf %136, %139 : vector<2x8x8xf32>
    %141 = math.exp %140 : vector<2x8x8xf32>
    %cst_68 = arith.constant dense<0.000000e+00> : vector<2x8xf32>
    %142 = vector.multi_reduction <add>, %141, %cst_68 [2] : vector<2x8x8xf32> to vector<2x8xf32>
    %143 = vector.shape_cast %142 : vector<2x8xf32> to vector<2x8x1xf32>
    %144 = tpu.reciprocal %143 : vector<2x8x1xf32> -> vector<2x8x1xf32>
    %145 = vector.broadcast %144 : vector<2x8x1xf32> to vector<2x8x8xf32>
    %146 = arith.mulf %141, %145 : vector<2x8x8xf32>
    %cst_69 = arith.constant dense<0.000000e+00> : vector<2x8x16xf32>
    %147 = tpu.matmul %146, %135, %cst_69 {dimension_numbers = #tpu.dot_dimension_numbers<[2], [1], [1], [2], [0, 0, 0, 1, 1, 2], [0], [0]>} : vector<2x8x8xf32>, vector<2x8x16xf32>, vector<2x8x16xf32> -> vector<2x8x16xf32>
    %148 = vector.shape_cast %147 : vector<2x8x16xf32> to vector<16x16xf32>
    %c0_70 = arith.constant 0 : index
    %c96_71 = arith.constant 96 : index
    %149 = vector.load %arg16[%c0_70, %c96_71] : memref<16x128xf32, #tpu.memory_space<vmem>>, vector<16x16xf32>
    tpu.vector_store %arg16[%c0_70, %c96_71], %148 {strides = array<i32>} : memref<16x128xf32, #tpu.memory_space<vmem>>, vector<16x16xf32>,
    %c0_72 = arith.constant 0 : index
    %c112 = arith.constant 112 : index
    %150 = vector.load %arg15[%c0_72, %c112] : memref<16x384xf32, #tpu.memory_space<vmem>>, vector<16x16xf32>
    %c0_73 = arith.constant 0 : index
    %c240 = arith.constant 240 : index
    %151 = vector.load %arg15[%c0_73, %c240] : memref<16x384xf32, #tpu.memory_space<vmem>>, vector<16x16xf32>
    %c0_74 = arith.constant 0 : index
    %c368 = arith.constant 368 : index
    %152 = vector.load %arg15[%c0_74, %c368] : memref<16x384xf32, #tpu.memory_space<vmem>>, vector<16x16xf32>
    %153 = vector.shape_cast %150 : vector<16x16xf32> to vector<2x8x16xf32>
    %154 = vector.shape_cast %151 : vector<16x16xf32> to vector<2x8x16xf32>
    %155 = vector.shape_cast %152 : vector<16x16xf32> to vector<2x8x16xf32>
    %cst_75 = arith.constant dense<0.000000e+00> : vector<2x8x8xf32>
    %156 = tpu.matmul %153, %154, %cst_75 {dimension_numbers = #tpu.dot_dimension_numbers<[2], [2], [1], [1], [0, 0, 0, 1, 1, 1], [0], [0]>} : vector<2x8x16xf32>, vector<2x8x16xf32>, vector<2x8x8xf32> -> vector<2x8x8xf32>
    %cst_76 = arith.constant dense<0xFF800000> : vector<2x8xf32>
    %157 = vector.multi_reduction <maximumf>, %156, %cst_76 [2] : vector<2x8x8xf32> to vector<2x8xf32>
    %158 = vector.shape_cast %157 : vector<2x8xf32> to vector<2x8x1xf32>
    %159 = vector.broadcast %158 : vector<2x8x1xf32> to vector<2x8x8xf32>
    %160 = arith.subf %156, %159 : vector<2x8x8xf32>
    %161 = math.exp %160 : vector<2x8x8xf32>
    %cst_77 = arith.constant dense<0.000000e+00> : vector<2x8xf32>
    %162 = vector.multi_reduction <add>, %161, %cst_77 [2] : vector<2x8x8xf32> to vector<2x8xf32>
    %163 = vector.shape_cast %162 : vector<2x8xf32> to vector<2x8x1xf32>
    %164 = tpu.reciprocal %163 : vector<2x8x1xf32> -> vector<2x8x1xf32>
    %165 = vector.broadcast %164 : vector<2x8x1xf32> to vector<2x8x8xf32>
    %166 = arith.mulf %161, %165 : vector<2x8x8xf32>
    %cst_78 = arith.constant dense<0.000000e+00> : vector<2x8x16xf32>
    %167 = tpu.matmul %166, %155, %cst_78 {dimension_numbers = #tpu.dot_dimension_numbers<[2], [1], [1], [2], [0, 0, 0, 1, 1, 2], [0], [0]>} : vector<2x8x8xf32>, vector<2x8x16xf32>, vector<2x8x16xf32> -> vector<2x8x16xf32>
    %168 = vector.shape_cast %167 : vector<2x8x16xf32> to vector<16x16xf32>
    %c0_79 = arith.constant 0 : index
    %c112_80 = arith.constant 112 : index
    %169 = vector.load %arg16[%c0_79, %c112_80] : memref<16x128xf32, #tpu.memory_space<vmem>>, vector<16x16xf32>
    tpu.vector_store %arg16[%c0_79, %c112_80], %168 {strides = array<i32>} : memref<16x128xf32, #tpu.memory_space<vmem>>, vector<16x16xf32>,
    %c0_81 = arith.constant 0 : index
    %c0_82 = arith.constant 0 : index
    %170 = vector.load %arg16[%c0_81, %c0_82] : memref<16x128xf32, #tpu.memory_space<vmem>>, vector<16x128xf32>
    %c0_83 = arith.constant 0 : index
    %c0_84 = arith.constant 0 : index
    %171 = vector.load %arg4[%c0_83, %c0_84] : memref<128x128xf32, #tpu.memory_space<vmem>>, vector<128x128xf32>
    %cst_85 = arith.constant dense<0.000000e+00> : vector<16x128xf32>
    %172 = tpu.matmul %170, %171, %cst_85 {dimension_numbers = #tpu.dot_dimension_numbers<[1], [0], [0], [1], [0, 0, 1, 1], [], []>} : vector<16x128xf32>, vector<128x128xf32>, vector<16x128xf32> -> vector<16x128xf32>
    %c0_86 = arith.constant 0 : index
    %c0_87 = arith.constant 0 : index
    %173 = vector.load %arg5[%c0_86, %c0_87] : memref<1x128xf32, #tpu.memory_space<vmem>>, vector<1x128xf32>
    %174 = vector.shape_cast %173 : vector<1x128xf32> to vector<128xf32>
    %175 = vector.shape_cast %174 : vector<128xf32> to vector<1x128xf32>
    %176 = vector.broadcast %175 : vector<1x128xf32> to vector<16x128xf32>
    %177 = arith.addf %172, %176 : vector<16x128xf32>
    %178 = arith.addf %177, %1 : vector<16x128xf32>
    %c0_88 = arith.constant 0 : index
    %c0_89 = arith.constant 0 : index
    %179 = vector.load %arg10[%c0_88, %c0_89] : memref<1x128xf32, #tpu.memory_space<vmem>>, vector<1x128xf32>
    %180 = vector.shape_cast %179 : vector<1x128xf32> to vector<128xf32>
    %c0_90 = arith.constant 0 : index
    %c0_91 = arith.constant 0 : index
    %181 = vector.load %arg11[%c0_90, %c0_91] : memref<1x128xf32, #tpu.memory_space<vmem>>, vector<1x128xf32>
    %182 = vector.shape_cast %181 : vector<1x128xf32> to vector<128xf32>
    %cst_92 = arith.constant dense<0.000000e+00> : vector<16xf32>
    %183 = vector.multi_reduction <add>, %178, %cst_92 [1] : vector<16x128xf32> to vector<16xf32>
    %184 = vector.shape_cast %183 : vector<16xf32> to vector<16x1xf32>
    %cst_93 = arith.constant 1.280000e+02 : f32
    %185 = vector.broadcast %cst_93 : f32 to vector<16x1xf32>
    %186 = arith.divf %184, %185 : vector<16x1xf32>
    %187 = vector.broadcast %186 : vector<16x1xf32> to vector<16x128xf32>
    %188 = arith.subf %178, %187 : vector<16x128xf32>
    %189 = arith.mulf %188, %188 : vector<16x128xf32>
    %cst_94 = arith.constant dense<0.000000e+00> : vector<16xf32>
    %190 = vector.multi_reduction <add>, %189, %cst_94 [1] : vector<16x128xf32> to vector<16xf32>
    %191 = vector.shape_cast %190 : vector<16xf32> to vector<16x1xf32>
    %cst_95 = arith.constant 1.280000e+02 : f32
    %192 = vector.broadcast %cst_95 : f32 to vector<16x1xf32>
    %193 = arith.divf %191, %192 : vector<16x1xf32>
    %194 = vector.broadcast %186 : vector<16x1xf32> to vector<16x128xf32>
    %195 = arith.subf %178, %194 : vector<16x128xf32>
    %cst_96 = arith.constant 9.99999974E-6 : f32
    %196 = vector.broadcast %cst_96 : f32 to vector<16x1xf32>
    %197 = arith.addf %193, %196 : vector<16x1xf32>
    %198 = math.rsqrt %197 : vector<16x1xf32>
    %199 = vector.broadcast %198 : vector<16x1xf32> to vector<16x128xf32>
    %200 = arith.mulf %195, %199 : vector<16x128xf32>
    %201 = vector.shape_cast %180 : vector<128xf32> to vector<1x128xf32>
    %202 = vector.broadcast %201 : vector<1x128xf32> to vector<16x128xf32>
    %203 = arith.mulf %200, %202 : vector<16x128xf32>
    %204 = vector.shape_cast %182 : vector<128xf32> to vector<1x128xf32>
    %205 = vector.broadcast %204 : vector<1x128xf32> to vector<16x128xf32>
    %206 = arith.addf %203, %205 : vector<16x128xf32>
    %c0_97 = arith.constant 0 : index
    %c0_98 = arith.constant 0 : index
    %207 = vector.load %arg6[%c0_97, %c0_98] : memref<128x512xf32, #tpu.memory_space<vmem>>, vector<128x512xf32>
    %cst_99 = arith.constant dense<0.000000e+00> : vector<16x512xf32>
    %208 = tpu.matmul %206, %207, %cst_99 {dimension_numbers = #tpu.dot_dimension_numbers<[1], [0], [0], [1], [0, 0, 1, 1], [], []>} : vector<16x128xf32>, vector<128x512xf32>, vector<16x512xf32> -> vector<16x512xf32>
    %c0_100 = arith.constant 0 : index
    %c0_101 = arith.constant 0 : index
    %209 = vector.load %arg7[%c0_100, %c0_101] : memref<1x512xf32, #tpu.memory_space<vmem>>, vector<1x512xf32>
    %210 = vector.shape_cast %209 : vector<1x512xf32> to vector<512xf32>
    %211 = vector.shape_cast %210 : vector<512xf32> to vector<1x512xf32>
    %212 = vector.broadcast %211 : vector<1x512xf32> to vector<16x512xf32>
    %213 = arith.addf %208, %212 : vector<16x512xf32>
    %cst_102 = arith.constant 0.000000e+00 : f32
    %214 = vector.broadcast %cst_102 : f32 to vector<16x512xf32>
    %215 = arith.maximumf %213, %214 : vector<16x512xf32>
    %c0_103 = arith.constant 0 : index
    %c0_104 = arith.constant 0 : index
    %216 = vector.load %arg8[%c0_103, %c0_104] : memref<512x128xf32, #tpu.memory_space<vmem>>, vector<512x128xf32>
    %cst_105 = arith.constant dense<0.000000e+00> : vector<16x128xf32>
    %217 = tpu.matmul %215, %216, %cst_105 {dimension_numbers = #tpu.dot_dimension_numbers<[1], [0], [0], [1], [0, 0, 1, 1], [], []>} : vector<16x512xf32>, vector<512x128xf32>, vector<16x128xf32> -> vector<16x128xf32>
    %c0_106 = arith.constant 0 : index
    %c0_107 = arith.constant 0 : index
    %218 = vector.load %arg9[%c0_106, %c0_107] : memref<1x128xf32, #tpu.memory_space<vmem>>, vector<1x128xf32>
    %219 = vector.shape_cast %218 : vector<1x128xf32> to vector<128xf32>
    %220 = vector.shape_cast %219 : vector<128xf32> to vector<1x128xf32>
    %221 = vector.broadcast %220 : vector<1x128xf32> to vector<16x128xf32>
    %222 = arith.addf %217, %221 : vector<16x128xf32>
    %223 = arith.addf %222, %206 : vector<16x128xf32>
    %c0_108 = arith.constant 0 : index
    %c0_109 = arith.constant 0 : index
    %224 = vector.load %arg12[%c0_108, %c0_109] : memref<1x128xf32, #tpu.memory_space<vmem>>, vector<1x128xf32>
    %225 = vector.shape_cast %224 : vector<1x128xf32> to vector<128xf32>
    %c0_110 = arith.constant 0 : index
    %c0_111 = arith.constant 0 : index
    %226 = vector.load %arg13[%c0_110, %c0_111] : memref<1x128xf32, #tpu.memory_space<vmem>>, vector<1x128xf32>
    %227 = vector.shape_cast %226 : vector<1x128xf32> to vector<128xf32>
    %cst_112 = arith.constant dense<0.000000e+00> : vector<16xf32>
    %228 = vector.multi_reduction <add>, %223, %cst_112 [1] : vector<16x128xf32> to vector<16xf32>
    %229 = vector.shape_cast %228 : vector<16xf32> to vector<16x1xf32>
    %cst_113 = arith.constant 1.280000e+02 : f32
    %230 = vector.broadcast %cst_113 : f32 to vector<16x1xf32>
    %231 = arith.divf %229, %230 : vector<16x1xf32>
    %232 = vector.broadcast %231 : vector<16x1xf32> to vector<16x128xf32>
    %233 = arith.subf %223, %232 : vector<16x128xf32>
    %234 = arith.mulf %233, %233 : vector<16x128xf32>
    %cst_114 = arith.constant dense<0.000000e+00> : vector<16xf32>
    %235 = vector.multi_reduction <add>, %234, %cst_114 [1] : vector<16x128xf32> to vector<16xf32>
    %236 = vector.shape_cast %235 : vector<16xf32> to vector<16x1xf32>
    %cst_115 = arith.constant 1.280000e+02 : f32
    %237 = vector.broadcast %cst_115 : f32 to vector<16x1xf32>
    %238 = arith.divf %236, %237 : vector<16x1xf32>
    %239 = vector.broadcast %231 : vector<16x1xf32> to vector<16x128xf32>
    %240 = arith.subf %223, %239 : vector<16x128xf32>
    %cst_116 = arith.constant 9.99999974E-6 : f32
    %241 = vector.broadcast %cst_116 : f32 to vector<16x1xf32>
    %242 = arith.addf %238, %241 : vector<16x1xf32>
    %243 = math.rsqrt %242 : vector<16x1xf32>
    %244 = vector.broadcast %243 : vector<16x1xf32> to vector<16x128xf32>
    %245 = arith.mulf %240, %244 : vector<16x128xf32>
    %246 = vector.shape_cast %225 : vector<128xf32> to vector<1x128xf32>
    %247 = vector.broadcast %246 : vector<1x128xf32> to vector<16x128xf32>
    %248 = arith.mulf %245, %247 : vector<16x128xf32>
    %249 = vector.shape_cast %227 : vector<128xf32> to vector<1x128xf32>
    %250 = vector.broadcast %249 : vector<1x128xf32> to vector<16x128xf32>
    %251 = arith.addf %248, %250 : vector<16x128xf32>
    %252 = vector.shape_cast %251 : vector<16x128xf32> to vector<2x8x128xf32>
    %c0_117 = arith.constant 0 : index
    %c0_118 = arith.constant 0 : index
    %c0_119 = arith.constant 0 : index
    %253 = vector.load %arg14[%c0_117, %c0_118, %c0_119] : memref<2x8x128xf32, #tpu.memory_space<vmem>>, vector<2x8x128xf32>
    tpu.vector_store %arg14[%c0_117, %c0_118, %c0_119], %252 {strides = array<i32>} : memref<2x8x128xf32, #tpu.memory_space<vmem>>, vector<2x8x128xf32>,
    return
  }
  func.func @transform_0(%arg0: i32) -> (i32, i32, i32) {
    %c0_i32 = arith.constant 0 : i32
    %c0_i32_0 = arith.constant 0 : i32
    %c0_i32_1 = arith.constant 0 : i32
    return %arg0, %c0_i32, %c0_i32_0 : i32, i32, i32
  }
  func.func @transform_1(%arg0: i32) -> (i32, i32) {
    %c0_i32 = arith.constant 0 : i32
    %c0_i32_0 = arith.constant 0 : i32
    %c0_i32_1 = arith.constant 0 : i32
    return %c0_i32, %c0_i32_0 : i32, i32
  }
  func.func @transform_2(%arg0: i32) -> (i32, i32) {
    %c0_i32 = arith.constant 0 : i32
    %c0_i32_0 = arith.constant 0 : i32
    %c0_i32_1 = arith.constant 0 : i32
    return %c0_i32, %c0_i32_0 : i32, i32
  }
  func.func @transform_3(%arg0: i32) -> (i32, i32) {
    %c0_i32 = arith.constant 0 : i32
    %c0_i32_0 = arith.constant 0 : i32
    %c0_i32_1 = arith.constant 0 : i32
    return %c0_i32, %c0_i32_0 : i32, i32
  }
  func.func @transform_4(%arg0: i32) -> (i32, i32) {
    %c0_i32 = arith.constant 0 : i32
    %c0_i32_0 = arith.constant 0 : i32
    %c0_i32_1 = arith.constant 0 : i32
    return %c0_i32, %c0_i32_0 : i32, i32
  }
  func.func @transform_5(%arg0: i32) -> (i32, i32) {
    %c0_i32 = arith.constant 0 : i32
    %c0_i32_0 = arith.constant 0 : i32
    %c0_i32_1 = arith.constant 0 : i32
    return %c0_i32, %c0_i32_0 : i32, i32
  }
  func.func @transform_6(%arg0: i32) -> (i32, i32) {
    %c0_i32 = arith.constant 0 : i32
    %c0_i32_0 = arith.constant 0 : i32
    %c0_i32_1 = arith.constant 0 : i32
    return %c0_i32, %c0_i32_0 : i32, i32
  }
  func.func @transform_7(%arg0: i32) -> (i32, i32) {
    %c0_i32 = arith.constant 0 : i32
    %c0_i32_0 = arith.constant 0 : i32
    %c0_i32_1 = arith.constant 0 : i32
    return %c0_i32, %c0_i32_0 : i32, i32
  }
  func.func @transform_8(%arg0: i32) -> (i32, i32) {
    %c0_i32 = arith.constant 0 : i32
    %c0_i32_0 = arith.constant 0 : i32
    %c0_i32_1 = arith.constant 0 : i32
    return %c0_i32, %c0_i32_0 : i32, i32
  }
  func.func @transform_9(%arg0: i32) -> (i32, i32) {
    %c0_i32 = arith.constant 0 : i32
    %c0_i32_0 = arith.constant 0 : i32
    %c0_i32_1 = arith.constant 0 : i32
    return %c0_i32, %c0_i32_0 : i32, i32
  }
  func.func @transform_10(%arg0: i32) -> (i32, i32) {
    %c0_i32 = arith.constant 0 : i32
    %c0_i32_0 = arith.constant 0 : i32
    %c0_i32_1 = arith.constant 0 : i32
    return %c0_i32, %c0_i32_0 : i32, i32
  }
  func.func @transform_11(%arg0: i32) -> (i32, i32) {
    %c0_i32 = arith.constant 0 : i32
    %c0_i32_0 = arith.constant 0 : i32
    %c0_i32_1 = arith.constant 0 : i32
    return %c0_i32, %c0_i32_0 : i32, i32
  }
  func.func @transform_12(%arg0: i32) -> (i32, i32) {
    %c0_i32 = arith.constant 0 : i32
    %c0_i32_0 = arith.constant 0 : i32
    %c0_i32_1 = arith.constant 0 : i32
    return %c0_i32, %c0_i32_0 : i32, i32
  }
  func.func @transform_13(%arg0: i32) -> (i32, i32, i32) {
    %c0_i32 = arith.constant 0 : i32
    %c0_i32_0 = arith.constant 0 : i32
    %c0_i32_1 = arith.constant 0 : i32
    return %arg0, %c0_i32, %c0_i32_0 : i32, i32, i32
  }
}

</mosaic_0001>

<bundles_post_ra>
// kernel: tpu_custom_call.1
= control target key start
LH: loop header
LB: loop body
LE: loop exit
PB: predicated region body
PF: predicated region fallthrough
CT: control target
= control target key end

     0   :  { %18 = vsyncpa [#allocation5], 0  ;;  %s3102_s0 = inlined_call_operand.hbm [shape: f32[2,8,128], index: 0, kind: input, shape index: {}]   ;;  %s3103_s1 = inlined_call_operand.hbm [shape: f32[128,384], index: 1, kind: input, shape index: {}]   ;;  %s3104_s2 = inlined_call_operand.hbm [shape: f32[1,384], index: 2, kind: input, shape index: {}]   ;;  %s3105_s3 = inlined_call_operand.hbm [shape: f32[128,128], index: 3, kind: input, shape index: {}]   ;;  %s3106_s4 = inlined_call_operand.vmem [shape: f32[1,128], index: 4, kind: input, shape index: {}]   ;;  %s3107_s5 = inlined_call_operand.hbm [shape: f32[128,512], index: 5, kind: input, shape index: {}]   ;;  %s3108_s6 = inlined_call_operand.vmem [shape: f32[1,512], index: 6, kind: input, shape index: {}]   ;;  %s3109_s7 = inlined_call_operand.hbm [shape: f32[512,128], index: 7, kind: input, shape index: {}]   ;;  %s3110_s8 = inlined_call_operand.vmem [shape: f32[1,128], index: 8, kind: input, shape index: {}]   ;;  %s3111_s9 = inlined_call_operand.vmem [shape: f32[1,128], index: 9, kind: input, shape index: {}]   ;;  %s3112_s10 = inlined_call_operand.vmem [shape: f32[1,128], index: 10, kind: input, shape index: {}]   ;;  %s3113_s11 = inlined_call_operand.vmem [shape: f32[1,128], index: 11, kind: input, shape index: {}]   ;;  %s3114_s12 = inlined_call_operand.vmem [shape: f32[1,128], index: 12, kind: input, shape index: {}]   ;;  %s3115_s13 = inlined_call_operand.hbm [shape: f32[2,8,128], index: 13, kind: output, shape index: {}]  }
   0x1   :  { %19 = vsyncpa [#allocation8], 0 }
   0x2   :  { %20 = vsyncpa [#allocation11], 0 }
   0x3   :  { %21 = vsyncpa [#allocation14], 0  ;;  %s40_s27 = sshll.u32 %s3103_s1, 4  ;;  %s41_s27 = int_to_ptr.hbm [resolvable:$true] %s40_s27 }
   0x4   :  { %22 = vsyncpa [#allocation6], 0  ;;  %s2540_s28 = smov [#allocation7]   ;;  %s2541_s30 = smov 384  }
   0x5   :  { %s42_s29 = sshll.u32 %s2540_s28, 4  ;;  %s2542_s14 = smov 24   ;;  %s43_s29 = int_to_ptr.vmem [resolvable:$true] %s42_s29 }
   0x6   :  { %48 = dma.hbm_to_vmem [thread:$0]  %s41_s27, 6144, %s43_s29, [#allocation8], %s2541_s30, %s2541_s30, %s2542_s14  }
   0x7   :  { %s64_s17 = sshll.u32 %s3105_s3, 4  ;;  %s2543_s18 = smov [#allocation10]   ;;  %s65_s17 = int_to_ptr.hbm [resolvable:$true] %s64_s17 }
   0x8   :  { %s66_s19 = sshll.u32 %s2543_s18, 4  ;;  %s27_s22 = sshll.u32 %s3102_s0, 4  ;;  %s67_s19 = int_to_ptr.vmem [resolvable:$true] %s66_s19  ;;  %s28_s22 = int_to_ptr.hbm [resolvable:$true] %s27_s22 }
   0x9   :  { %s2544_s1 = smov 128   ;;  %s2545_s23 = smov 8  }
   0xa   :  { %72 = dma.hbm_to_vmem [thread:$0]  %s65_s17, 2048, %s67_s19, [#allocation11], %s2544_s1, %s2544_s1, %s2545_s23  }
   0xb   :  { %s54_s26 = sshll.u32 %s3104_s2, 4  ;;  %s2546_s3 = smov [#allocation4]   ;;  %s55_s26 = int_to_ptr.hbm [resolvable:$true] %s54_s26 }
   0xc   :  { %s29_s27 = sshll.u32 %s2546_s3, 4  ;;  %s2547_s0 = smov [#allocation9]   ;;  %s30_s27 = int_to_ptr.vmem [resolvable:$true] %s29_s27 }
   0xd   :  { %35 = dma.hbm_to_vmem [thread:$0]  %s28_s22, 256, %s30_s27, [#allocation5], %s2544_s1, %s2544_s1, %s2545_s23  }
   0xe   :  { %s56_s28 = sshll.u32 %s2547_s0, 4  ;;  %s79_s14 = sshll.u32 %s3107_s5, 4  ;;  %s57_s28 = int_to_ptr.vmem [resolvable:$true] %s56_s28  ;;  %s80_s14 = int_to_ptr.hbm [resolvable:$true] %s79_s14 }
   0xf   :  { %59 = dma.hbm_to_vmem [thread:$0]  %s55_s26, 48, %s57_s28, [#allocation8]  }
  0x10   :  { %s2548_s15 = smov [#allocation12]   ;;  %s94_s18 = sshll.u32 %s3109_s7, 4  ;;  %s95_s18 = int_to_ptr.hbm [resolvable:$true] %s94_s18 }
  0x11   :  { %s81_s16 = sshll.u32 %s2548_s15, 4  ;;  %s2549_s19 = smov 512   ;;  %s82_s16 = int_to_ptr.vmem [resolvable:$true] %s81_s16 }
  0x12   :  { %s2550_s20 = smov 32   ;;  %s2551_s21 = smov [#allocation13]  }
  0x13   :  { %87 = dma.hbm_to_vmem [thread:$0]  %s80_s14, 8192, %s82_s16, [#allocation11], %s2549_s19, %s2549_s19, %s2550_s20  }
  0x14   :  { %s96_s22 = sshll.u32 %s2551_s21, 4  ;;  %s97_s22 = int_to_ptr.vmem [resolvable:$true] %s96_s22 }
  0x15   :  { %102 = dma.hbm_to_vmem [thread:$0]  %s95_s18, 8192, %s97_s22, [#allocation14], %s2544_s1, %s2544_s1, %s2545_s23  }
  0x16   :  { %2530 = dma.done.wait [#allocation5], 256  }
  0x17   :  { %2531 = vsyncadd [#allocation5], 4294967040 }
  0x18   :  { %2532 = dma.done.wait [#allocation8], 6192  }
  0x19   :  { %2533 = vsyncadd [#allocation8], 4294961104 }
  0x1a   :  { %2534 = dma.done.wait [#allocation11], 10240  }
  0x1b   :  { %2535 = vsyncadd [#allocation11], 4294957056 }
  0x1c   :  { %2536 = dma.done.wait [#allocation14], 8192  }
  0x1d   :  { %2537 = vsyncadd [#allocation14], 4294959104  ;;  %v185_v0 = vld [vmem:[#allocation7 + $0x170] sm:$0xff]  ;;  %v182_v1 = vld [vmem:[#allocation7 + $0x158] sm:$0xff]  ;;  %vm276_vm0 = vcmask 130048   ;;  %s2552_s5 = smov 112  }
  0x1e   :  { %v184_v2 = vld [vmem:[#allocation7 + $0x168] sm:$0xff]  ;;  %218 = vmatpush.msra.mxu1 %v185_v0  ;;  %v181_v3 = vld [vmem:[#allocation7 + $0x150] sm:$0xff]  ;;  %v179_v4 = vld [vmem:[#allocation7 + $0x140] sm:$0xff]  ;;  %s2553_s7 = smov 96   ;;  %vm329_vm1 = vcmask 64512   ;;  %s2554_s24 = smov 64  }
  0x1f   :  { %195 = vmatpush.msra.mxu0 %v184_v2  ;;  %v178_v5 = vld [vmem:[#allocation7 + $0x138] sm:$0xff]  ;;  %v176_v6 = vld [vmem:[#allocation7 + $0x128] sm:$0xff]  ;;  %v175_v7 = vld [vmem:[#allocation7 + $0x120] sm:$0xff]  ;;  %s2555_s25 = smov 80   ;;  %s2556_s26 = smov 48  }
  0x20   :  { %219 = vmatpush.msra.mxu1 %v182_v1  ;;  %v173_v8 = vld [vmem:[#allocation7 + $0x110] sm:$0xff]  ;;  %v172_v9 = vld [vmem:[#allocation7 + $0x108] sm:$0xff]  ;;  %v170_v10 = vld [vmem:[#allocation7 + $0xf8] sm:$0xff]  ;;  %s2557_s3 = smov 16   ;;  %s2559_s17 = smov [#allocation15]  }
  0x21   :  { %196 = vmatpush.msra.mxu0 %v181_v3  ;;  %v169_v11 = vld [vmem:[#allocation7 + $0xf0] sm:$0xff]  ;;  %v167_v12 = vld [vmem:[#allocation7 + $0xe0] sm:$0xff]  ;;  %v166_v13 = vld [vmem:[#allocation7 + $0xd8] sm:$0xff] }
  0x22   :  { %220 = vmatpush.msra.mxu1 %v179_v4  ;;  %v164_v14 = vld [vmem:[#allocation7 + $0xc8] sm:$0xff]  ;;  %v163_v15 = vld [vmem:[#allocation7 + $0xc0] sm:$0xff]  ;;  %v161_v16 = vld [vmem:[#allocation7 + $0xb0] sm:$0xff] }
  0x23   :  { %197 = vmatpush.msra.mxu0 %v178_v5  ;;  %v160_v17 = vld [vmem:[#allocation7 + $0xa8] sm:$0xff]  ;;  %v158_v18 = vld [vmem:[#allocation7 + $0x98] sm:$0xff]  ;;  %v157_v19 = vld [vmem:[#allocation7 + $0x90] sm:$0xff] }
  0x24   :  { %221 = vmatpush.msra.mxu1 %v176_v6  ;;  %v155_v20 = vld [vmem:[#allocation7 + $0x80] sm:$0xff]  ;;  %v154_v21 = vld [vmem:[#allocation7 + $0x78] sm:$0xff]  ;;  %v152_v22 = vld [vmem:[#allocation7 + $0x68] sm:$0xff] }
  0x25   :  { %198 = vmatpush.msra.mxu0 %v175_v7  ;;  %v151_v23 = vld [vmem:[#allocation7 + $0x60] sm:$0xff]  ;;  %v149_v24 = vld [vmem:[#allocation7 + $0x50] sm:$0xff]  ;;  %v148_v25 = vld [vmem:[#allocation7 + $0x48] sm:$0xff] }
  0x26   :  { %222 = vmatpush.msra.mxu1 %v173_v8  ;;  %v146_v26 = vld [vmem:[#allocation7 + $0x38] sm:$0xff]  ;;  %v145_v27 = vld [vmem:[#allocation7 + $0x30] sm:$0xff]  ;;  %v143_v28 = vld [vmem:[#allocation7 + $0x20] sm:$0xff] }
  0x27   :  { %199 = vmatpush.msra.mxu0 %v172_v9  ;;  %v142_v29 = vld [vmem:[#allocation7 + $0x18] sm:$0xff]  ;;  %v140_v30 = vld [vmem:[#allocation7 + $0x8] sm:$0xff]  ;;  %v139_v31 = vld [vmem:[#allocation7] sm:$0xff] }
  0x28   :  { %223 = vmatpush.msra.mxu1 %v170_v10  ;;  %v2658_v32 = vld [vmem:[#allocation4] sm:$0xff]  ;;  %v2662_v33 = vld [vmem:[#allocation4 + $0x8] sm:$0xff]  ;;  %v2666_v34 = vld [vmem:[#allocation9] sm:$0x7] }
  0x29   :  { %200 = vmatpush.msra.mxu0 %v169_v11  ;;  %v190_v35 = vperm.slane %v2666_v34, 1  ;;  %v189_v36 = vperm.slane %v2666_v34, 0  ;;  %v186_v45 = vld [vmem:[#allocation7 + $0x178] sm:$0xff]  ;;  %v183_v46 = vld [vmem:[#allocation7 + $0x160] sm:$0xff]  ;;  %v180_v47 = vld [vmem:[#allocation7 + $0x148] sm:$0xff]  ;;  %v191_v9 = vperm.slane %v2666_v34, 2 }
  0x2a   :  { %224 = vmatpush.msra.mxu1 %v167_v12  ;;  %241 = vmatpush.msra.mxu2 %v186_v45  ;;  %v177_v48 = vld [vmem:[#allocation7 + $0x130] sm:$0xff]  ;;  %v174_v49 = vld [vmem:[#allocation7 + $0x118] sm:$0xff]  ;;  %v171_v50 = vld [vmem:[#allocation7 + $0x100] sm:$0xff] }
  0x2b   :  { %201 = vmatpush.msra.mxu0 %v166_v13  ;;  %v168_v51 = vld [vmem:[#allocation7 + $0xe8] sm:$0xff]  ;;  %v165_v52 = vld [vmem:[#allocation7 + $0xd0] sm:$0xff]  ;;  %v162_v53 = vld [vmem:[#allocation7 + $0xb8] sm:$0xff] }
  0x2c   :  { %225 = vmatpush.msra.mxu1 %v164_v14  ;;  %242 = vmatpush.msra.mxu2 %v183_v46  ;;  %v159_v54 = vld [vmem:[#allocation7 + $0xa0] sm:$0xff]  ;;  %v156_v55 = vld [vmem:[#allocation7 + $0x88] sm:$0xff]  ;;  %v153_v56 = vld [vmem:[#allocation7 + $0x70] sm:$0xff] }
  0x2d   :  { %202 = vmatpush.msra.mxu0 %v163_v15  ;;  %v150_v57 = vld [vmem:[#allocation7 + $0x58] sm:$0xff]  ;;  %v147_v58 = vld [vmem:[#allocation7 + $0x40] sm:$0xff]  ;;  %v144_v59 = vld [vmem:[#allocation7 + $0x28] sm:$0xff] }
  0x2e   :  { %226 = vmatpush.msra.mxu1 %v161_v16  ;;  %243 = vmatpush.msra.mxu2 %v180_v47  ;;  %v141_v61 = vld [vmem:[#allocation7 + $0x10] sm:$0xff] }
  0x2f   :  { %203 = vmatpush.msra.mxu0 %v160_v17 }
  0x30   :  { %227 = vmatpush.msra.mxu1 %v158_v18  ;;  %244 = vmatpush.msra.mxu2 %v177_v48 }
  0x31   :  { %204 = vmatpush.msra.mxu0 %v157_v19 }
  0x32   :  { %228 = vmatpush.msra.mxu1 %v155_v20  ;;  %245 = vmatpush.msra.mxu2 %v174_v49 }
  0x33   :  { %205 = vmatpush.msra.mxu0 %v154_v21 }
  0x34   :  { %229 = vmatpush.msra.mxu1 %v152_v22  ;;  %246 = vmatpush.msra.mxu2 %v171_v50 }
  0x35   :  { %206 = vmatpush.msra.mxu0 %v151_v23 }
  0x36   :  { %230 = vmatpush.msra.mxu1 %v149_v24  ;;  %247 = vmatpush.msra.mxu2 %v168_v51 }
  0x37   :  { %207 = vmatpush.msra.mxu0 %v148_v25 }
  0x38   :  { %231 = vmatpush.msra.mxu1 %v146_v26  ;;  %248 = vmatpush.msra.mxu2 %v165_v52 }
  0x39   :  { %208 = vmatpush.msra.mxu0 %v145_v27 }
  0x3a   :  { %232 = vmatpush.msra.mxu1 %v143_v28  ;;  %249 = vmatpush.msra.mxu2 %v162_v53 }
  0x3b   :  { %209 = vmatpush.msra.mxu0 %v142_v29 }
  0x3c   :  { %233 = vmatpush.msra.mxu1 %v140_v30  ;;  %250 = vmatpush.msra.mxu2 %v159_v54 }
  0x3d   :  { %210 = vmatpush.msra.mxu0 %v139_v31  ;;  %234 = vmatmul.f32.vlgmr.msra.gmra.mxu1 %v2658_v32 }
  0x3e   :  { %211 = vmatmul.f32.vlgmr.msra.gmra.mxu0 %v2658_v32  ;;  %251 = vmatpush.msra.mxu2 %v156_v55 }
  0x40   :  { %252 = vmatpush.msra.mxu2 %v153_v56 }
  0x42   :  { %253 = vmatpush.msra.mxu2 %v150_v57 }
  0x44   :  { %254 = vmatpush.msra.mxu2 %v147_v58 }
  0x45   :  { %237 = vmatmul.f32.gmra.mxu1 %v2662_v33 }
  0x46   :  { %214 = vmatmul.f32.gmra.mxu0 %v2662_v33  ;;  %255 = vmatpush.msra.mxu2 %v144_v59 }
  0x48   :  { %256 = vmatpush.msra.mxu2 %v141_v61 }
  0x49   :  { %257 = vmatmul.f32.vlgmr.msra.gmra.mxu2 %v2658_v32 }
  0x51   :  { %260 = vmatmul.f32.gmra.mxu2 %v2662_v33 }
  0xba   :  { %v235_v37 = vpop.f32.mrf.mxu1 }
  0xbb   :  { %v212_v38 = vpop.f32.mrf.mxu0  ;;  %v2670_v39 = vadd.f32 %v235_v37, %v190_v35 }
  0xbc   :  { %v2672_v40 = vadd.f32 %v212_v38, %v189_v36 }
  0xbd   :  { %436 = vrot.lane.b32.xlu2 %v2670_v39, %s2552_s5  ;;  %2197 = vmatpush.xpose.msk.msra.mxu3 %vm276_vm0, %v2670_v39 }
  0xc0   :  { %2198 = vmatmul.msk.f32.vlgmr.msra.gmra.mxu3 %vm276_vm0, %v2672_v40 }
  0xc2   :  { %v238_v41 = vpop.f32.mrf.mxu1 }
  0xc3   :  { %v215_v42 = vpop.f32.mrf.mxu0  ;;  %v2680_v43 = vadd.f32 %v238_v41, %v190_v35 }
  0xc4   :  { %v2682_v44 = vadd.f32 %v215_v42, %v189_v36 }
  0xc5   :  { %2199 = vmatpush.xpose.msk.msrb.mxu3 %vm276_vm0, %v2680_v43  ;;  %433 = vrot.lane.b32.xlu2 %v2672_v40, %s2552_s5 }
  0xc8   :  { %2200 = vmatmul.msk.f32.vlgmr.msrb.gmra.mxu3 %vm276_vm0, %v2682_v44 }
  0xcc   :  { %v258_v10 = vpop.f32.mrf.mxu2 }
  0xcd   :  { %615 = vrot.lane.b32.xlu2 %v2670_v39, %s2553_s7  ;;  %v2702_v12 = vadd.f32 %v258_v10, %v191_v9 }
  0xcf   :  { %396 = vmatpush.msra.mxu3 %v2702_v12 }
  0xd4   :  { %v261_v14 = vpop.f32.mrf.mxu2 }
  0xd5   :  { %612 = vrot.lane.b32.xlu2 %v2672_v40, %s2553_s7  ;;  %v2714_v15 = vadd.f32 %v261_v14, %v191_v9 }
  0xd7   :  { %419 = vmatpush.msrb.mxu3 %v2714_v15 }
 0x117   :  { %v437_v27 = vpop.permute.xlu2 %436 }
 0x11f   :  { %v434_v42 = vpop.permute.xlu2 %433 }
 0x127   :  { %v616_v48 = vpop.permute.xlu2 %615 }
 0x12f   :  { %v613_v51 = vpop.permute.xlu2 %612 }
 0x143   :  { %v300_v60 = vpop.f32.mrf.mxu3 }
 0x144   :  { %v330_v62 = vsel %vm329_vm1, %v300_v60, -inf }
 0x145   :  { %331 = vmax.xlane.f32.xlu0 %v330_v62 }
 0x14b   :  { %v326_v63 = vpop.f32.mrf.mxu3 }
 0x14c   :  { %v333_v0 = vsel %vm329_vm1, %v326_v63, -inf }
 0x14d   :  { %334 = vmax.xlane.f32.xlu0 %v333_v0 }
 0x161   :  { %466 = vrot.lane.b32.xlu0 %v2680_v43, %s2552_s5 }
 0x1b8   :  { %v332_v1 = vpop.xlane.xlu0 %331 }
 0x1b9   :  { %v336_v2 = vsub.f32 %v300_v60, %v332_v1 }
 0x1bb   :  { %v338_v3 = vmul.f32 1.442695, %v336_v2 }
 0x1bd   :  { %2286 = vpow2.f32 %v338_v3 }
 0x1c0   :  { %v335_v4 = vpop.xlane.xlu0 %334 }
 0x1c1   :  { %v337_v5 = vsub.f32 %v326_v63, %v335_v4 }
 0x1c3   :  { %v2287_v6 = vpop.eup %2286  ;;  %v340_v7 = vmul.f32 1.442695, %v337_v5 }
 0x1c4   :  { %v342_v8 = vsel %vm329_vm1, %v2287_v6, 0.0 }
 0x1c5   :  { %2288 = vpow2.f32 %v340_v7  ;;  %343 = vadd.xlane.f32.xlu1 %v342_v8 }
 0x1cb   :  { %v2289_v11 = vpop.eup %2288 }
 0x1cc   :  { %v345_v13 = vsel %vm329_vm1, %v2289_v11, 0.0 }
 0x1cd   :  { %346 = vadd.xlane.f32.xlu1 %v345_v13 }
 0x1d3   :  { %v467_v46 = vpop.permute.xlu0 %466 }
 0x1e6   :  { %463 = vrot.lane.b32.xlu1 %v2682_v44, %s2552_s5 }
 0x1ee   :  { %720 = vrot.lane.b32.xlu1 %v2702_v12, %s2553_s7 }
 0x1f6   :  { %973 = vrot.lane.b32.xlu1 %v2670_v39, %s2554_s24 }
 0x1fe   :  { %970 = vrot.lane.b32.xlu1 %v2672_v40, %s2554_s24 }
 0x238   :  { %v344_v16 = vpop.xlane.xlu1 %343 }
 0x239   :  { %2290 = vrcp.f32 %v344_v16  ;;  %v359_v21 = vand.u32 2147483648, %v344_v16  ;;  %v357_v23 = vand.u32 2147483647, %v344_v16  ;;  %vm353_vm3 = vweird.f32 %v344_v16 }
 0x23b   :  { %v360_v26 = vor.u32 1.1754944e-38, %v359_v21  ;;  %vm358_vm5 = vcmp.eq.f32.partialorder %v357_v23, 8.507059e+37 }
 0x23f   :  { %v2291_v17 = vpop.eup %2290 }
 0x240   :  { %v349_v18 = vmul.f32 %v2291_v17, %v344_v16  ;;  %v347_v19 = vpop.xlane.xlu1 %346  ;;  %vm354_vm2 = vweird.f32 %v2291_v17 }
 0x241   :  { %2292 = vrcp.f32 %v347_v19  ;;  %vm355_vm4 = vmor %vm353_vm3, %vm354_vm2  ;;  %v373_v33 = vand.u32 2147483648, %v347_v19  ;;  %v371_v35 = vand.u32 2147483647, %v347_v19  ;;  %vm367_vm7 = vweird.f32 %v347_v19 }
 0x242   :  { %v350_v20 = vsub.f32 1.0, %v349_v18 }
 0x243   :  { %v374_v37 = vor.u32 1.1754944e-38, %v373_v33  ;;  %vm372_vm9 = vcmp.eq.f32.partialorder %v371_v35, 8.507059e+37 }
 0x244   :  { %v351_v22 = vmul.f32 %v2291_v17, %v350_v20 }
 0x246   :  { %v352_v24 = vadd.f32 %v2291_v17, %v351_v22 }
 0x247   :  { %v2293_v25 = vpop.eup %2292 }
 0x248   :  { %v356_v28 = vsel %vm355_vm4, %v2291_v17, %v352_v24  ;;  %v363_v29 = vmul.f32 %v2293_v25, %v347_v19  ;;  %vm368_vm6 = vweird.f32 %v2293_v25 }
 0x249   :  { %v361_v30 = vsel %vm358_vm5, %v360_v26, %v356_v28  ;;  %vm369_vm8 = vmor %vm367_vm7, %vm368_vm6 }
 0x24a   :  { %v364_v31 = vsub.f32 1.0, %v363_v29  ;;  %v376_v32 = vmul.f32 %v2287_v6, %v361_v30 }
 0x24c   :  { %v365_v34 = vmul.f32 %v2293_v25, %v364_v31  ;;  %2201 = vmatmul.msk.f32.vlgmr.msra.gmra.mxu3 %vm329_vm1, %v376_v32 }
 0x24d   :  { %2203 = vmatpush.xpose.msk.msra.mxu3 %vm276_vm0, %v437_v27 }
 0x24e   :  { %v366_v36 = vadd.f32 %v2293_v25, %v365_v34 }
 0x250   :  { %v370_v38 = vsel %vm369_vm8, %v2293_v25, %v366_v36 }
 0x251   :  { %v375_v41 = vsel %vm372_vm9, %v374_v37, %v370_v38 }
 0x252   :  { %v377_v45 = vmul.f32 %v2289_v11, %v375_v41 }
 0x254   :  { %2202 = vmatmul.msk.f32.vlgmr.msrb.gmra.mxu3 %vm329_vm1, %v377_v45 }
 0x255   :  { %2205 = vmatpush.xpose.msk.msrb.mxu3 %vm276_vm0, %v467_v46 }
 0x258   :  { %v464_v47 = vpop.permute.xlu1 %463 }
 0x25c   :  { %2204 = vmatmul.msk.f32.vlgmr.msra.gmra.mxu3 %vm276_vm0, %v434_v42 }
 0x25d   :  { %2209 = vmatpush.xpose.msk.msra.mxu3 %vm276_vm0, %v616_v48 }
 0x260   :  { %v721_v49 = vpop.permute.xlu1 %720 }
 0x264   :  { %2206 = vmatmul.msk.f32.vlgmr.msrb.gmra.mxu3 %vm276_vm0, %v464_v47 }
 0x268   :  { %v974_v50 = vpop.permute.xlu1 %973 }
 0x269   :  { %2221 = vmatpush.xpose.msk.msrb.mxu2 %vm276_vm0, %v974_v50 }
 0x26c   :  { %2210 = vmatmul.msk.f32.vlgmr.msra.gmra.mxu3 %vm276_vm0, %v613_v51 }
 0x270   :  { %v971_v52 = vpop.permute.xlu1 %970 }
 0x271   :  { %2222 = vmatmul.msk.f32.vlgmr.msrb.gmra.mxu2 %vm276_vm0, %v971_v52 }
 0x2cf   :  { %v398_v53 = vpop.f32.mrf.mxu3 }
 0x2d0   :  { %424 = vst.msk [vmem:[#allocation3] sm:$0xff] %vm276_vm0, %v398_v53 }
 0x2d7   :  { %v421_v54 = vpop.f32.mrf.mxu3 }
 0x2d8   :  { %425 = vst.msk [vmem:[#allocation3 + $0x8] sm:$0xff] %vm276_vm0, %v421_v54 }
 0x2df   :  { %v459_v55 = vpop.f32.mrf.mxu3 }
 0x2e0   :  { %v492_v56 = vsel %vm329_vm1, %v459_v55, -inf }
 0x2e1   :  { %493 = vmax.xlane.f32.xlu2 %v492_v56 }
 0x2e7   :  { %v2730_v57 = vpop.f32.mrf.mxu3 }
 0x2e8   :  { %v495_v18 = vsel %vm329_vm1, %v2730_v57, -inf }
 0x2ef   :  { %v638_v58 = vpop.f32.mrf.mxu3 }
 0x2f0   :  { %v671_v59 = vsel %vm329_vm1, %v638_v58, -inf }
 0x2f1   :  { %672 = vmax.xlane.f32.xlu0 %v671_v59 }
 0x2f4   :  { %v996_v56 = vpop.f32.mrf.mxu2 }
 0x2f9   :  { %645 = vrot.lane.b32.xlu2 %v2680_v43, %s2553_s7 }
 0x301   :  { %794 = vrot.lane.b32.xlu2 %v2670_v39, %s2555_s25 }
 0x305   :  { %541 = vrot.lane.b32.xlu0 %v2702_v12, %s2552_s5 }
 0x309   :  { %791 = vrot.lane.b32.xlu2 %v2672_v40, %s2555_s25 }
 0x30d   :  { %642 = vrot.lane.b32.xlu0 %v2682_v44, %s2553_s7 }
 0x311   :  { %1003 = vrot.lane.b32.xlu2 %v2680_v43, %s2554_s24 }
 0x315   :  { %824 = vrot.lane.b32.xlu0 %v2680_v43, %s2555_s25 }
 0x31d   :  { %821 = vrot.lane.b32.xlu0 %v2682_v44, %s2555_s25 }
 0x325   :  { %1152 = vrot.lane.b32.xlu0 %v2670_v39, %s2556_s26 }
 0x32d   :  { %1182 = vrot.lane.b32.xlu0 %v2680_v43, %s2556_s26 }
 0x335   :  { %1328 = vrot.lane.b32.xlu0 %v2672_v40, %s2550_s20 }
 0x33d   :  { %1358 = vrot.lane.b32.xlu0 %v2682_v44, %s2550_s20 }
 0x345   :  { %1537 = vrot.lane.b32.xlu0 %v2682_v44, %s2557_s3 }
 0x354   :  { %v494_v60 = vpop.xlane.xlu2 %493 }
 0x355   :  { %v498_v61 = vsub.f32 %v459_v55, %v494_v60 }
 0x357   :  { %v500_v62 = vmul.f32 1.442695, %v498_v61 }
 0x359   :  { %2294 = vpow2.f32 %v500_v62 }
 0x35c   :  { %v646_v63 = vpop.permute.xlu2 %645 }
 0x35d   :  { %2211 = vmatpush.xpose.msk.msrb.mxu3 %vm276_vm0, %v646_v63 }
 0x35f   :  { %v2295_v0 = vpop.eup %2294 }
 0x360   :  { %v504_v1 = vsel %vm329_vm1, %v2295_v0, 0.0 }
 0x361   :  { %505 = vadd.xlane.f32.xlu1 %v504_v1 }
 0x364   :  { %v673_v2 = vpop.xlane.xlu0 %672  ;;  %v795_v7 = vpop.permute.xlu2 %794 }
 0x365   :  { %v677_v3 = vsub.f32 %v638_v58, %v673_v2  ;;  %v1029_v58 = vsel %vm329_vm1, %v996_v56, -inf }
 0x367   :  { %v679_v4 = vmul.f32 1.442695, %v677_v3 }
 0x369   :  { %2296 = vpow2.f32 %v679_v4 }
 0x36c   :  { %v2767_v9 = vpop.permute.xlu2 %791 }
 0x36f   :  { %v2761_v5 = vpop.eup %2296 }
 0x370   :  { %v683_v6 = vsel %vm329_vm1, %v2761_v5, 0.0 }
 0x371   :  { %684 = vadd.xlane.f32.xlu2 %v683_v6 }
 0x374   :  { %v1004_v13 = vpop.permute.xlu2 %1003 }
 0x377   :  { %v542_v8 = vpop.permute.xlu0 %541 }
 0x378   :  { %562 = vmatpush.msrb.mxu0 %v542_v8 }
 0x37a   :  { %741 = vmatpush.msra.mxu0 %v721_v49  ;;  %1000 = vrot.lane.b32.xlu1 %v2682_v44, %s2554_s24 }
 0x37f   :  { %v643_v10 = vpop.permute.xlu0 %642 }
 0x380   :  { %2212 = vmatmul.msk.f32.vlgmr.msrb.gmra.mxu3 %vm276_vm0, %v643_v10 }
 0x382   :  { %1331 = vrot.lane.b32.xlu1 %v2670_v39, %s2550_s20 }
 0x387   :  { %v825_v11 = vpop.permute.xlu0 %824 }
 0x388   :  { %2217 = vmatpush.xpose.msk.msra.mxu3 %vm276_vm0, %v825_v11 }
 0x389   :  { %1149 = vrot.lane.b32.xlu2 %v2672_v40, %s2556_s26 }
 0x38a   :  { %1361 = vrot.lane.b32.xlu1 %v2680_v43, %s2550_s20 }
 0x38c   :  { %2223 = vmatpush.xpose.msk.msrb.mxu3 %vm276_vm0, %v1004_v13 }
 0x38f   :  { %v822_v14 = vpop.permute.xlu0 %821 }
 0x390   :  { %2218 = vmatmul.msk.f32.vlgmr.msra.gmra.mxu3 %vm276_vm0, %v822_v14 }
 0x391   :  { %1179 = vrot.lane.b32.xlu2 %v2682_v44, %s2556_s26 }
 0x392   :  { %1507 = vrot.lane.b32.xlu1 %v2672_v40, %s2557_s3 }
 0x397   :  { %v1153_v16 = vpop.permute.xlu0 %1152 }
 0x398   :  { %2227 = vmatpush.xpose.msk.msra.mxu2 %vm276_vm0, %v1153_v16 }
 0x399   :  { %1510 = vrot.lane.b32.xlu2 %v2670_v39, %s2557_s3 }
 0x39f   :  { %v1183_v17 = vpop.permute.xlu0 %1182 }
 0x3a0   :  { %2229 = vmatpush.xpose.msk.msra.mxu3 %vm276_vm0, %v1183_v17 }
 0x3a1   :  { %1540 = vrot.lane.b32.xlu2 %v2680_v43, %s2557_s3 }
 0x3a7   :  { %v1329_v37 = vpop.permute.xlu0 %1328 }
 0x3af   :  { %v1359_v50 = vpop.permute.xlu0 %1358 }
 0x3b7   :  { %v1538_v55 = vpop.permute.xlu0 %1537 }
 0x3bc   :  { %496 = vmax.xlane.f32.xlu1 %v495_v18 }
 0x3d4   :  { %v506_v44 = vpop.xlane.xlu1 %505 }
 0x3d5   :  { %2298 = vrcp.f32 %v506_v44  ;;  %v521_v22 = vand.u32 2147483648, %v506_v44  ;;  %v519_v23 = vand.u32 2147483647, %v506_v44  ;;  %vm515_vm11 = vweird.f32 %v506_v44 }
 0x3d7   :  { %v522_v24 = vor.u32 1.1754944e-38, %v521_v22  ;;  %vm520_vm13 = vcmp.eq.f32.partialorder %v519_v23, 8.507059e+37 }
 0x3db   :  { %v2299_v19 = vpop.eup %2298 }
 0x3dc   :  { %v511_v40 = vmul.f32 %v2299_v19, %v506_v44  ;;  %vm516_vm10 = vweird.f32 %v2299_v19 }
 0x3dd   :  { %vm517_vm12 = vmor %vm515_vm11, %vm516_vm10 }
 0x3de   :  { %v512_v20 = vsub.f32 1.0, %v511_v40 }
 0x3e0   :  { %v513_v21 = vmul.f32 %v2299_v19, %v512_v20 }
 0x3e2   :  { %v514_v39 = vadd.f32 %v2299_v19, %v513_v21 }
 0x3e4   :  { %v685_v25 = vpop.xlane.xlu2 %684  ;;  %v518_v26 = vsel %vm517_vm12, %v2299_v19, %v514_v39 }
 0x3e5   :  { %2300 = vrcp.f32 %v685_v25  ;;  %v523_v43 = vsel %vm520_vm13, %v522_v24, %v518_v26  ;;  %v700_v33 = vand.u32 2147483648, %v685_v25  ;;  %v698_v35 = vand.u32 2147483647, %v685_v25 }
 0x3e6   :  { %v538_v27 = vmul.f32 %v2295_v0, %v523_v43  ;;  %vm694_vm15 = vweird.f32 %v685_v25 }
 0x3e7   :  { %v701_v38 = vor.u32 1.1754944e-38, %v700_v33  ;;  %vm699_vm3 = vcmp.eq.f32.partialorder %v698_v35, 8.507059e+37 }
 0x3e8   :  { %2207 = vmatmul.msk.f32.vlgmr.msrb.gmra.mxu0 %vm329_vm1, %v538_v27 }
 0x3e9   :  { %2215 = vmatpush.xpose.msk.msrb.mxu0 %vm276_vm0, %v795_v7 }
 0x3eb   :  { %v2301_v28 = vpop.eup %2300 }
 0x3ec   :  { %v690_v29 = vmul.f32 %v2301_v28, %v685_v25  ;;  %v1001_v30 = vpop.permute.xlu1 %1000  ;;  %v1150_v31 = vpop.permute.xlu2 %1149  ;;  %vm695_vm14 = vweird.f32 %v2301_v28 }
 0x3ed   :  { %2224 = vmatmul.msk.f32.vlgmr.msrb.gmra.mxu3 %vm276_vm0, %v1001_v30  ;;  %2228 = vmatmul.msk.f32.vlgmr.msra.gmra.mxu2 %vm276_vm0, %v1150_v31  ;;  %vm696_vm2 = vmor %vm694_vm15, %vm695_vm14 }
 0x3ee   :  { %v691_v32 = vsub.f32 1.0, %v690_v29 }
 0x3f0   :  { %v692_v34 = vmul.f32 %v2301_v28, %v691_v32 }
 0x3f2   :  { %v693_v36 = vadd.f32 %v2301_v28, %v692_v34 }
 0x3f4   :  { %v697_v41 = vsel %vm696_vm2, %v2301_v28, %v693_v36  ;;  %v1332_v42 = vpop.permute.xlu1 %1331  ;;  %v1180_v45 = vpop.permute.xlu2 %1179 }
 0x3f5   :  { %v702_v46 = vsel %vm699_vm3, %v701_v38, %v697_v41  ;;  %2230 = vmatmul.msk.f32.vlgmr.msra.gmra.mxu3 %vm276_vm0, %v1180_v45  ;;  %2233 = vmatpush.xpose.msk.msrb.mxu2 %vm276_vm0, %v1332_v42 }
 0x3f6   :  { %v717_v47 = vmul.f32 %v2761_v5, %v702_v46 }
 0x3f8   :  { %2213 = vmatmul.msk.f32.vlgmr.msra.gmra.mxu0 %vm329_vm1, %v717_v47  ;;  %2234 = vmatmul.msk.f32.vlgmr.msrb.gmra.mxu2 %vm276_vm0, %v1329_v37 }
 0x3fc   :  { %v1362_v48 = vpop.permute.xlu1 %1361  ;;  %v1511_v49 = vpop.permute.xlu2 %1510 }
 0x3fd   :  { %2235 = vmatpush.xpose.msk.msrb.mxu3 %vm276_vm0, %v1362_v48  ;;  %2239 = vmatpush.xpose.msk.msra.mxu2 %vm276_vm0, %v1511_v49 }
 0x400   :  { %2216 = vmatmul.msk.f32.vlgmr.msrb.gmra.mxu0 %vm276_vm0, %v2767_v9  ;;  %2236 = vmatmul.msk.f32.vlgmr.msrb.gmra.mxu3 %vm276_vm0, %v1359_v50 }
 0x403   :  { %v668_v51 = vpop.f32.mrf.mxu3 }
 0x404   :  { %v1508_v52 = vpop.permute.xlu1 %1507  ;;  %v1541_v53 = vpop.permute.xlu2 %1540  ;;  %v674_v54 = vsel %vm329_vm1, %v668_v51, -inf }
 0x405   :  { %675 = vmax.xlane.f32.xlu2 %v674_v54  ;;  %2240 = vmatmul.msk.f32.vlgmr.msra.gmra.mxu2 %vm276_vm0, %v1508_v52 }
 0x406   :  { %2241 = vmatpush.xpose.msk.msra.mxu3 %vm276_vm0, %v1541_v53 }
 0x409   :  { %2242 = vmatmul.msk.f32.vlgmr.msra.gmra.mxu3 %vm276_vm0, %v1538_v55 }
 0x40d   :  { %1030 = vmax.xlane.f32.xlu2 %v1029_v58 }
 0x413   :  { %v847_v59 = vpop.f32.mrf.mxu3 }
 0x414   :  { %v853_v60 = vsel %vm329_vm1, %v847_v59, -inf }
 0x415   :  { %854 = vmax.xlane.f32.xlu1 %v853_v60 }
 0x42f   :  { %v497_v1 = vpop.xlane.xlu1 %496 }
 0x430   :  { %v499_v5 = vsub.f32 %v2730_v57, %v497_v1 }
 0x432   :  { %v502_v8 = vmul.f32 1.442695, %v499_v5 }
 0x434   :  { %2302 = vpow2.f32 %v502_v8 }
 0x43a   :  { %v2827_v19 = vpop.eup %2302 }
 0x43b   :  { %v507_v39 = vsel %vm329_vm1, %v2827_v19, 0.0 }
 0x465   :  { %v2819_v9 = vpop.f32.mrf.mxu0 }
 0x470   :  { %v1026_v61 = vpop.f32.mrf.mxu3  ;;  %v1175_v62 = vpop.f32.mrf.mxu2 }
 0x471   :  { %v1032_v63 = vsel %vm329_vm1, %v1026_v61, -inf  ;;  %v1208_v0 = vsel %vm329_vm1, %v1175_v62, -inf }
 0x472   :  { %1033 = vmax.xlane.f32.xlu0 %v1032_v63  ;;  %1209 = vmax.xlane.f32.xlu1 %v1208_v0  ;;  %v2265_v63 = vpack.i.bf16 %v2714_v15, %v2702_v12 }
 0x475   :  { %v2825_v57 = vpop.f32.mrf.mxu0 }
 0x478   :  { %v676_v2 = vpop.xlane.xlu2 %675  ;;  %v1205_v3 = vpop.f32.mrf.mxu3 }
 0x479   :  { %v1211_v4 = vsel %vm329_vm1, %v1205_v3, -inf  ;;  %v678_v17 = vsub.f32 %v668_v51, %v676_v2 }
 0x47a   :  { %1212 = vmax.xlane.f32.xlu2 %v1211_v4 }
 0x47b   :  { %v2815_v6 = vpop.f32.mrf.mxu2  ;;  %v681_v22 = vmul.f32 1.442695, %v678_v17 }
 0x47c   :  { %v1387_v7 = vsel %vm329_vm1, %v2815_v6, -inf }
 0x47d   :  { %1388 = vmax.xlane.f32.xlu0 %v1387_v7  ;;  %v817_v43 = vpop.f32.mrf.mxu0 }
 0x47e   :  { %v850_v29 = vsel %vm329_vm1, %v817_v43, -inf }
 0x480   :  { %v1031_v10 = vpop.xlane.xlu2 %1030 }
 0x481   :  { %v1035_v11 = vsub.f32 %v996_v56, %v1031_v10 }
 0x483   :  { %v2821_v13 = vpop.f32.mrf.mxu3  ;;  %v1037_v14 = vmul.f32 1.442695, %v1035_v11 }
 0x484   :  { %v1390_v16 = vsel %vm329_vm1, %v2821_v13, -inf }
 0x485   :  { %1391 = vmax.xlane.f32.xlu1 %v1390_v16  ;;  %2304 = vpow2.f32 %v1037_v14 }
 0x488   :  { %v1533_v18 = vpop.f32.mrf.mxu2  ;;  %v855_v44 = vpop.xlane.xlu1 %854 }
 0x489   :  { %v857_v40 = vsub.f32 %v847_v59, %v855_v44  ;;  %v1566_v20 = vsel %vm329_vm1, %v1533_v18, -inf }
 0x48a   :  { %1567 = vmax.xlane.f32.xlu2 %v1566_v20 }
 0x48b   :  { %v860_v21 = vmul.f32 1.442695, %v857_v40  ;;  %v2836_v25 = vpop.eup %2304 }
 0x48c   :  { %v2830_v23 = vpop.f32.mrf.mxu3  ;;  %v1041_v26 = vsel %vm329_vm1, %v2836_v25, 0.0 }
 0x48d   :  { %2306 = vpow2.f32 %v860_v21  ;;  %v1569_v24 = vsel %vm329_vm1, %v2830_v23, -inf  ;;  %508 = vadd.xlane.f32.xlu1 %v507_v39 }
 0x48e   :  { %1570 = vmax.xlane.f32.xlu0 %v1569_v24  ;;  %2308 = vpow2.f32 %v681_v22 }
 0x492   :  { %1042 = vadd.xlane.f32.xlu2 %v1041_v26 }
 0x493   :  { %v2840_v27 = vpop.eup %2306 }
 0x494   :  { %v865_v28 = vsel %vm329_vm1, %v2840_v27, 0.0  ;;  %v2845_v30 = vpop.eup %2308 }
 0x495   :  { %866 = vadd.xlane.f32.xlu1 %v865_v28  ;;  %v686_v31 = vsel %vm329_vm1, %v2845_v30, 0.0 }
 0x496   :  { %851 = vmax.xlane.f32.xlu0 %v850_v29 }
 0x49a   :  { %687 = vadd.xlane.f32.xlu2 %v686_v31 }
 0x4aa   :  { %568 = vrot.lane.b32.xlu0 %v2714_v15, %s2552_s5 }
 0x4e5   :  { %v1034_v32 = vpop.xlane.xlu0 %1033  ;;  %v1210_v33 = vpop.xlane.xlu1 %1209 }
 0x4e6   :  { %v1036_v34 = vsub.f32 %v1026_v61, %v1034_v32  ;;  %v1214_v35 = vsub.f32 %v1175_v62, %v1210_v33 }
 0x4e8   :  { %v1039_v36 = vmul.f32 1.442695, %v1036_v34  ;;  %v1216_v37 = vmul.f32 1.442695, %v1214_v35 }
 0x4ea   :  { %2310 = vpow2.f32 %v1039_v36 }
 0x4eb   :  { %2312 = vpow2.f32 %v1216_v37 }
 0x4ed   :  { %v1213_v38 = vpop.xlane.xlu2 %1212 }
 0x4ee   :  { %v1215_v41 = vsub.f32 %v1205_v3, %v1213_v38 }
 0x4f0   :  { %v2851_v42 = vpop.eup %2310  ;;  %v1218_v45 = vmul.f32 1.442695, %v1215_v41  ;;  %v1389_v51 = vpop.xlane.xlu0 %1388 }
 0x4f1   :  { %v2853_v46 = vpop.eup %2312  ;;  %v1044_v47 = vsel %vm329_vm1, %v2851_v42, 0.0  ;;  %v1393_v40 = vsub.f32 %v2815_v6, %v1389_v51 }
 0x4f2   :  { %2314 = vpow2.f32 %v1218_v45  ;;  %1045 = vadd.xlane.f32.xlu1 %v1044_v47  ;;  %v1220_v48 = vsel %vm329_vm1, %v2853_v46, 0.0 }
 0x4f3   :  { %1221 = vadd.xlane.f32.xlu2 %v1220_v48  ;;  %v1395_v20 = vmul.f32 1.442695, %v1393_v40 }
 0x4f8   :  { %v2859_v49 = vpop.eup %2314  ;;  %v1392_v50 = vpop.xlane.xlu1 %1391 }
 0x4f9   :  { %v1223_v52 = vsel %vm329_vm1, %v2859_v49, 0.0  ;;  %v1394_v21 = vsub.f32 %v2821_v13, %v1392_v50 }
 0x4fa   :  { %1224 = vadd.xlane.f32.xlu0 %v1223_v52 }
 0x4fb   :  { %v1397_v39 = vmul.f32 1.442695, %v1394_v21 }
 0x4fd   :  { %v1568_v53 = vpop.xlane.xlu2 %1567 }
 0x4fe   :  { %v1572_v54 = vsub.f32 %v1533_v18, %v1568_v53 }
 0x500   :  { %v1574_v55 = vmul.f32 1.442695, %v1572_v54  ;;  %v509_v56 = vpop.xlane.xlu1 %508 }
 0x501   :  { %v1571_v58 = vpop.xlane.xlu0 %1570  ;;  %2316 = vrcp.f32 %v509_v56  ;;  %v535_v7 = vand.u32 2147483648, %v509_v56  ;;  %vm529_vm4 = vweird.f32 %v509_v56  ;;  %v533_v10 = vand.u32 2147483647, %v509_v56 }
 0x502   :  { %2318 = vpow2.f32 %v1574_v55  ;;  %v1573_v22 = vsub.f32 %v2830_v23, %v1571_v58 }
 0x503   :  { %v536_v16 = vor.u32 1.1754944e-38, %v535_v7  ;;  %vm534_vm6 = vcmp.eq.f32.partialorder %v533_v10, 8.507059e+37 }
 0x504   :  { %v1576_v24 = vmul.f32 1.442695, %v1573_v22 }
 0x505   :  { %v2901_v28 = vpop.xlane.xlu2 %1042 }
 0x507   :  { %v2317_v59 = vpop.eup %2316 }
 0x508   :  { %v2863_v60 = vpop.eup %2318  ;;  %v525_v61 = vmul.f32 %v2317_v59, %v509_v56  ;;  %vm530_vm0 = vweird.f32 %v2317_v59  ;;  %v867_v31 = vpop.xlane.xlu1 %866 }
 0x509   :  { %v852_v62 = vpop.xlane.xlu0 %851  ;;  %v1578_v2 = vsel %vm329_vm1, %v2863_v60, 0.0  ;;  %vm531_vm5 = vmor %vm529_vm4, %vm530_vm0  ;;  %vm887_vm12 = vweird.f32 %v867_v31 }
 0x50a   :  { %v526_v0 = vsub.f32 1.0, %v525_v61  ;;  %v856_v1 = vsub.f32 %v817_v43, %v852_v62  ;;  %1579 = vadd.xlane.f32.xlu0 %v1578_v2  ;;  %v893_v62 = vand.u32 2147483648, %v867_v31 }
 0x50b   :  { %2266 = vrot.lane.b32.xlu2 %v2265_v63, %s2555_s25  ;;  %747 = vrot.lane.b32.xlu1 %v2714_v15, %s2553_s7 }
 0x50c   :  { %v858_v3 = vmul.f32 1.442695, %v856_v1  ;;  %v527_v4 = vmul.f32 %v2317_v59, %v526_v0  ;;  %v894_v7 = vor.u32 1.1754944e-38, %v893_v62 }
 0x50d   :  { %v688_v29 = vpop.xlane.xlu2 %687 }
 0x50e   :  { %2320 = vpow2.f32 %v858_v3  ;;  %v528_v5 = vadd.f32 %v2317_v59, %v527_v4  ;;  %v714_v47 = vand.u32 2147483648, %v688_v29  ;;  %vm708_vm8 = vweird.f32 %v688_v29 }
 0x50f   :  { %2322 = vpow2.f32 %v1395_v20  ;;  %v712_v48 = vand.u32 2147483647, %v688_v29 }
 0x510   :  { %v532_v14 = vsel %vm531_vm5, %v2317_v59, %v528_v5  ;;  %2324 = vpow2.f32 %v1397_v39  ;;  %v715_v55 = vor.u32 1.1754944e-38, %v714_v47 }
 0x511   :  { %v537_v17 = vsel %vm534_vm6, %v536_v16, %v532_v14  ;;  %2326 = vpow2.f32 %v1576_v24  ;;  %vm713_vm10 = vcmp.eq.f32.partialorder %v712_v48, 8.507059e+37 }
 0x512   :  { %v539_v44 = vmul.f32 %v2827_v19, %v537_v17  ;;  %2328 = vrcp.f32 %v688_v29 }
 0x513   :  { %2271 = vrot.lane.b32.xlu2 %v2265_v63, %s2554_s24  ;;  %2330 = vrcp.f32 %v867_v31 }
 0x514   :  { %v2873_v8 = vpop.eup %2320 }
 0x515   :  { %v862_v11 = vsel %vm329_vm1, %v2873_v8, 0.0  ;;  %v2883_v26 = vpop.eup %2322 }
 0x516   :  { %863 = vadd.xlane.f32.xlu0 %v862_v11  ;;  %v1399_v6 = vsel %vm329_vm1, %v2883_v26, 0.0  ;;  %v2889_v19 = vpop.eup %2324 }
 0x517   :  { %v2891_v13 = vpop.eup %2326  ;;  %v1402_v23 = vsel %vm329_vm1, %v2889_v19, 0.0 }
 0x518   :  { %v1581_v43 = vsel %vm329_vm1, %v2891_v13, 0.0  ;;  %v2329_v32 = vpop.eup %2328 }
 0x519   :  { %v704_v34 = vmul.f32 %v2329_v32, %v688_v29  ;;  %v2331_v36 = vpop.eup %2330  ;;  %vm709_vm7 = vweird.f32 %v2329_v32 }
 0x51a   :  { %vm710_vm9 = vmor %vm708_vm8, %vm709_vm7  ;;  %vm888_vm11 = vweird.f32 %v2331_v36 }
 0x51b   :  { %vm889_vm13 = vmor %vm887_vm12, %vm888_vm11 }
 0x51c   :  { %v569_v18 = vpop.permute.xlu0 %568 }
 0x51d   :  { %589 = vmatpush.msrb.mxu1 %v569_v18 }
 0x51e   :  { %2208 = vmatmul.msk.f32.vlgmr.msrb.gmra.mxu1 %vm329_vm1, %v539_v44 }
 0x52a   :  { %2276 = vrot.lane.b32.xlu0 %v2265_v63, %s2556_s26  ;;  %v891_v63 = vand.u32 2147483647, %v867_v31 }
 0x52c   :  { %vm892_vm14 = vcmp.eq.f32.partialorder %v891_v63, 8.507059e+37 }
 0x532   :  { %1615 = vrot.lane.b32.xlu0 %v2702_v12, %s2557_s3 }
 0x535   :  { %1400 = vadd.xlane.f32.xlu1 %v1399_v6 }
 0x53a   :  { %1642 = vrot.lane.b32.xlu0 %v2714_v15, %s2557_s3 }
 0x53c   :  { %1403 = vadd.xlane.f32.xlu2 %v1402_v23 }
 0x53d   :  { %1582 = vadd.xlane.f32.xlu1 %v1581_v43 }
 0x542   :  { %596 = vrot.lane.b32.xlu0 %v2819_v9, %s2557_s3  ;;  %v705_v9 = vsub.f32 1.0, %v704_v34 }
 0x554   :  { %1463 = vrot.lane.b32.xlu2 %v2714_v15, %s2550_s20  ;;  %v883_v15 = vmul.f32 %v2331_v36, %v867_v31 }
 0x556   :  { %1436 = vrot.lane.b32.xlu1 %v2702_v12, %s2550_s20  ;;  %v706_v12 = vmul.f32 %v2329_v32, %v705_v9  ;;  %v884_v41 = vsub.f32 1.0, %v883_v15 }
 0x558   :  { %v707_v45 = vadd.f32 %v2329_v32, %v706_v12  ;;  %v885_v52 = vmul.f32 %v2331_v36, %v884_v41 }
 0x55a   :  { %v711_v53 = vsel %vm710_vm9, %v2329_v32, %v707_v45  ;;  %v886_v59 = vadd.f32 %v2331_v36, %v885_v52 }
 0x55b   :  { %v716_v58 = vsel %vm713_vm10, %v715_v55, %v711_v53  ;;  %v1058_v53 = vand.u32 2147483648, %v2901_v28  ;;  %v1056_v55 = vand.u32 2147483647, %v2901_v28 }
 0x55c   :  { %v718_v1 = vmul.f32 %v2845_v30, %v716_v58  ;;  %v890_v3 = vsel %vm889_vm13, %v2331_v36, %v886_v59  ;;  %vm1052_vm13 = vweird.f32 %v2901_v28 }
 0x55d   :  { %v895_v11 = vsel %vm892_vm14, %v894_v7, %v890_v3 }
 0x55e   :  { %775 = vrot.lane.b32.xlu1 %v2825_v57, %s2550_s20  ;;  %v897_v18 = vmul.f32 %v2840_v27, %v895_v11 }
 0x565   :  { %v2911_v35 = vpop.xlane.xlu1 %1045 }
 0x566   :  { %v2909_v33 = vpop.xlane.xlu2 %1221  ;;  %2332 = vrcp.f32 %v2911_v35  ;;  %v1072_v16 = vand.u32 2147483648, %v2911_v35  ;;  %vm1066_vm2 = vweird.f32 %v2911_v35  ;;  %v1070_v17 = vand.u32 2147483647, %v2911_v35 }
 0x568   :  { %v1073_v21 = vor.u32 1.1754944e-38, %v1072_v16  ;;  %vm1071_vm0 = vcmp.eq.f32.partialorder %v1070_v17, 8.507059e+37 }
 0x56c   :  { %v2333_v57 = vpop.eup %2332 }
 0x56d   :  { %v1062_v54 = vmul.f32 %v2333_v57, %v2911_v35  ;;  %v2915_v56 = vpop.xlane.xlu0 %1224  ;;  %vm1067_vm15 = vweird.f32 %v2333_v57 }
 0x56e   :  { %v2267_v37 = vpop.permute.xlu2 %2266  ;;  %2334 = vrcp.f32 %v2915_v56  ;;  %vm1068_vm3 = vmor %vm1066_vm2, %vm1067_vm15  ;;  %v1251_v15 = vand.u32 2147483648, %v2915_v56  ;;  %vm1245_vm6 = vweird.f32 %v2915_v56  ;;  %vm1057_vm15 = vcmp.eq.f32.partialorder %v1056_v55, 8.507059e+37 }
 0x56f   :  { %v2268_v38 = vunpack.i.l.bf16 %v2267_v37  ;;  %v1063_v61 = vsub.f32 1.0, %v1062_v54  ;;  %v2269_v2 = vunpack.i.h.bf16 %v2267_v37  ;;  %2336 = vrcp.f32 %v2901_v28 }
 0x571   :  { %920 = vmatpush.msra.mxu0 %v2268_v38  ;;  %v1064_v4 = vmul.f32 %v2333_v57, %v1063_v61  ;;  %v1249_v38 = vand.u32 2147483647, %v2915_v56 }
 0x573   :  { %v1065_v30 = vadd.f32 %v2333_v57, %v1064_v4  ;;  %vm1250_vm12 = vcmp.eq.f32.partialorder %v1249_v38, 8.507059e+37  ;;  %v1237_v4 = vand.u32 2147483648, %v2909_v33 }
 0x574   :  { %v2335_v14 = vpop.eup %2334 }
 0x575   :  { %v2927_v44 = vpop.eup %2336  ;;  %v1069_v40 = vsel %vm1068_vm3, %v2333_v57, %v1065_v30  ;;  %v1241_v20 = vmul.f32 %v2335_v14, %v2915_v56  ;;  %vm1246_vm4 = vweird.f32 %v2335_v14  ;;  %vm1231_vm3 = vweird.f32 %v2909_v33 }
 0x576   :  { %v2272_v50 = vpop.permute.xlu2 %2271  ;;  %v1048_v39 = vmul.f32 %v2927_v44, %v2901_v28  ;;  %v1074_v24 = vsel %vm1071_vm0, %v1073_v21, %v1069_v40  ;;  %vm2944_vm7 = vmor %vm1245_vm6, %vm1246_vm4  ;;  %vm1053_vm9 = vweird.f32 %v2927_v44  ;;  %v1238_v30 = vor.u32 1.1754944e-38, %v1237_v4 }
 0x577   :  { %v2273_v51 = vunpack.i.l.bf16 %v2272_v50  ;;  %v2274_v5 = vunpack.i.h.bf16 %v2272_v50  ;;  %v1242_v6 = vsub.f32 1.0, %v1241_v20  ;;  %v1076_v27 = vmul.f32 %v2851_v42, %v1074_v24  ;;  %vm1054_vm14 = vmor %vm1052_vm13, %vm1053_vm9 }
 0x578   :  { %v1049_v23 = vsub.f32 1.0, %v1048_v39 }
 0x579   :  { %1099 = vmatpush.msrb.mxu0 %v2273_v51  ;;  %v1243_v29 = vmul.f32 %v2335_v14, %v1242_v6  ;;  %v1252_v51 = vor.u32 1.1754944e-38, %v1251_v15 }
 0x57a   :  { %v1050_v34 = vmul.f32 %v2927_v44, %v1049_v23 }
 0x57b   :  { %v1244_v36 = vadd.f32 %v2335_v14, %v1243_v29 }
 0x57c   :  { %v1051_v57 = vadd.f32 %v2927_v44, %v1050_v34 }
 0x57d   :  { %v748_v0 = vpop.permute.xlu1 %747  ;;  %v2920_v10 = vpop.xlane.xlu0 %1579  ;;  %v1248_v47 = vsel %vm2944_vm7, %v2335_v14, %v1244_v36 }
 0x57e   :  { %768 = vmatpush.msra.mxu1 %v748_v0  ;;  %v1253_v56 = vsel %vm1250_vm12, %v1252_v51, %v1248_v47  ;;  %v1055_v62 = vsel %vm1054_vm14, %v2927_v44, %v1051_v57 }
 0x57f   :  { %2214 = vmatmul.msk.f32.vlgmr.msra.gmra.mxu1 %vm329_vm1, %v718_v1  ;;  %v1255_v28 = vmul.f32 %v2859_v49, %v1253_v56 }
 0x580   :  { %947 = vmatpush.msrb.mxu1 %v2269_v2  ;;  %v1059_v2 = vor.u32 1.1754944e-38, %v1058_v53 }
 0x582   :  { %1126 = vmatpush.msra.mxu1 %v2274_v5  ;;  %v1235_v5 = vand.u32 2147483647, %v2909_v33 }
 0x584   :  { %vm1236_vm4 = vcmp.eq.f32.partialorder %v1235_v5, 8.507059e+37 }
 0x587   :  { %2220 = vmatmul.msk.f32.vlgmr.msrb.gmra.mxu1 %vm329_vm1, %v897_v18 }
 0x589   :  { %v864_v22 = vpop.xlane.xlu0 %863 }
 0x58a   :  { %2338 = vrcp.f32 %v864_v22  ;;  %v879_v37 = vand.u32 2147483648, %v864_v22  ;;  %v877_v12 = vand.u32 2147483647, %v864_v22  ;;  %vm873_vm8 = vweird.f32 %v864_v22 }
 0x58b   :  { %2340 = vrcp.f32 %v2909_v33 }
 0x58c   :  { %v880_v48 = vor.u32 1.1754944e-38, %v879_v37  ;;  %vm878_vm11 = vcmp.eq.f32.partialorder %v877_v12, 8.507059e+37 }
 0x58f   :  { %2226 = vmatmul.msk.f32.vlgmr.msra.gmra.mxu1 %vm329_vm1, %v1076_v27 }
 0x590   :  { %v2339_v43 = vpop.eup %2338 }
 0x591   :  { %v2936_v31 = vpop.eup %2340  ;;  %v869_v32 = vmul.f32 %v2339_v43, %v864_v22  ;;  %vm874_vm5 = vweird.f32 %v2339_v43 }
 0x592   :  { %v1227_v35 = vmul.f32 %v2936_v31, %v2909_v33  ;;  %vm875_vm10 = vmor %vm873_vm8, %vm874_vm5  ;;  %vm1232_vm2 = vweird.f32 %v2936_v31  ;;  %vm602_vm5 = vcmask 261248  }
 0x593   :  { %v870_v9 = vsub.f32 1.0, %v869_v32  ;;  %vm1233_vm0 = vmor %vm1231_vm3, %vm1232_vm2 }
 0x594   :  { %v1228_v50 = vsub.f32 1.0, %v1227_v35 }
 0x595   :  { %v871_v42 = vmul.f32 %v2339_v43, %v870_v9 }
 0x596   :  { %v1229_v63 = vmul.f32 %v2936_v31, %v1228_v50 }
 0x597   :  { %v872_v45 = vadd.f32 %v2339_v43, %v871_v42 }
 0x598   :  { %v1230_v3 = vadd.f32 %v2936_v31, %v1229_v63 }
 0x599   :  { %v876_v52 = vsel %vm875_vm10, %v2339_v43, %v872_v45 }
 0x59a   :  { %v881_v54 = vsel %vm878_vm11, %v880_v48, %v876_v52  ;;  %v1234_v11 = vsel %vm1233_vm0, %v2936_v31, %v1230_v3 }
 0x59b   :  { %v591_v58 = vpop.f32.mrf.mxu1  ;;  %v896_v59 = vmul.f32 %v2873_v8, %v881_v54  ;;  %v1060_v8 = vsel %vm1057_vm15, %v1059_v2, %v1055_v62  ;;  %v1239_v14 = vsel %vm1236_vm4, %v1238_v30, %v1234_v11  ;;  %vm1589_vm4 = vweird.f32 %v2920_v10 }
 0x59c   :  { %v2277_v61 = vpop.permute.xlu0 %2276  ;;  %598 = vrot.lane.b32.xlu1 %v591_v58, %s2557_s3  ;;  %v1075_v7 = vmul.f32 %v2836_v25, %v1060_v8  ;;  %v1254_v17 = vmul.f32 %v2853_v46, %v1239_v14 }
 0x59d   :  { %v2279_v0 = vunpack.i.h.bf16 %v2277_v61  ;;  %v2278_v1 = vunpack.i.l.bf16 %v2277_v61  ;;  %2219 = vmatmul.msk.f32.vlgmr.msra.gmra.mxu0 %vm329_vm1, %v896_v59  ;;  %v1595_v61 = vand.u32 2147483648, %v2920_v10 }
 0x59f   :  { %1278 = vmatpush.msra.mxu0 %v2278_v1  ;;  %1305 = vmatpush.msrb.mxu1 %v2279_v0  ;;  %v1596_v2 = vor.u32 1.1754944e-38, %v1595_v61  ;;  %v1846_v61 = vld [vmem:[#allocation12 + $0x1e8] sm:$0xff] }
 0x5a0   :  { %2232 = vmatmul.msk.f32.vlgmr.msrb.gmra.mxu1 %vm329_vm1, %v1255_v28 }
 0x5a4   :  { %v2970_v49 = vpop.permute.xlu0 %1615 }
 0x5a5   :  { %2225 = vmatmul.msk.f32.vlgmr.msrb.gmra.mxu0 %vm329_vm1, %v1075_v7 }
 0x5a8   :  { %v1401_v16 = vpop.xlane.xlu1 %1400 }
 0x5a9   :  { %2342 = vrcp.f32 %v1401_v16  ;;  %vm1410_vm12 = vweird.f32 %v1401_v16  ;;  %v1416_v41 = vand.u32 2147483648, %v1401_v16  ;;  %v1414_v47 = vand.u32 2147483647, %v1401_v16 }
 0x5ab   :  { %v1417_v54 = vor.u32 1.1754944e-38, %v1416_v41  ;;  %vm1415_vm2 = vcmp.eq.f32.partialorder %v1414_v47, 8.507059e+37 }
 0x5ac   :  { %v1643_v18 = vpop.permute.xlu0 %1642 }
 0x5ad   :  { %2231 = vmatmul.msk.f32.vlgmr.msra.gmra.mxu0 %vm329_vm1, %v1254_v17 }
 0x5af   :  { %v1404_v33 = vpop.xlane.xlu2 %1403  ;;  %v2343_v44 = vpop.eup %2342 }
 0x5b0   :  { %2344 = vrcp.f32 %v1404_v33  ;;  %v1583_v25 = vpop.xlane.xlu1 %1582  ;;  %v1406_v40 = vmul.f32 %v2343_v44, %v1401_v16  ;;  %v1428_v29 = vand.u32 2147483647, %v1404_v33  ;;  %v1430_v31 = vand.u32 2147483648, %v1404_v33 }
 0x5b1   :  { %2346 = vrcp.f32 %v2920_v10  ;;  %vm1424_vm7 = vweird.f32 %v1404_v33  ;;  %vm1411_vm8 = vweird.f32 %v2343_v44  ;;  %v1609_v57 = vand.u32 2147483648, %v1583_v25 }
 0x5b2   :  { %2348 = vrcp.f32 %v1583_v25  ;;  %v1407_v39 = vsub.f32 1.0, %v1406_v40  ;;  %vm1429_vm10 = vcmp.eq.f32.partialorder %v1428_v29, 8.507059e+37  ;;  %v1431_v15 = vor.u32 1.1754944e-38, %v1430_v31  ;;  %vm1412_vm13 = vmor %vm1410_vm12, %vm1411_vm8  ;;  %v1694_v40 = vld [vmem:[#allocation10 + $0x68] sm:$0xff]  ;;  %v1685_v29 = vld [vmem:[#allocation10 + $0x20] sm:$0xff] }
 0x5b3   :  { %vm1603_vm14 = vweird.f32 %v1583_v25  ;;  %v1607_v48 = vand.u32 2147483647, %v1583_v25  ;;  %v1610_v55 = vor.u32 1.1754944e-38, %v1609_v57  ;;  %vm781_vm8 = vcmask 392448  }
 0x5b4   :  { %v597_v20 = vpop.permute.xlu0 %596  ;;  %v1408_v32 = vmul.f32 %v2343_v44, %v1407_v39 }
 0x5b5   :  { %603 = vst.msk [vmem:[#allocation3] sm:$0xff] %vm602_vm5, %v597_v20  ;;  %vm1608_vm3 = vcmp.eq.f32.partialorder %v1607_v48, 8.507059e+37  ;;  %v1693_v20 = vld [vmem:[#allocation10 + $0x60] sm:$0xff]  ;;  %v2360_v48 = vld [vmem:[#allocation4] sm:$0xff] }
 0x5b6   :  { %v2345_v21 = vpop.eup %2344  ;;  %v1409_v42 = vadd.f32 %v2343_v44, %v1408_v32  ;;  %v1684_v32 = vld [vmem:[#allocation10 + $0x18] sm:$0xff] }
 0x5b7   :  { %v2978_v22 = vpop.eup %2346  ;;  %v1420_v46 = vmul.f32 %v2345_v21, %v1404_v33  ;;  %v1464_v24 = vpop.permute.xlu2 %1463  ;;  %vm1425_vm6 = vweird.f32 %v2345_v21 }
 0x5b8   :  { %v2349_v6 = vpop.eup %2348  ;;  %1484 = vmatpush.msra.mxu1 %v1464_v24  ;;  %v1585_v43 = vmul.f32 %v2978_v22, %v2920_v10  ;;  %vm1426_vm9 = vmor %vm1424_vm7, %vm1425_vm6  ;;  %v1413_v52 = vsel %vm1412_vm13, %v2343_v44, %v1409_v42  ;;  %vm1590_vm0 = vweird.f32 %v2978_v22  ;;  %v1696_v44 = vld [vmem:[#allocation10 + $0x78] sm:$0xff]  ;;  %v1689_v24 = vld [vmem:[#allocation10 + $0x40] sm:$0xff] }
 0x5b9   :  { %v1421_v27 = vsub.f32 1.0, %v1420_v46  ;;  %v1599_v23 = vmul.f32 %v2349_v6, %v1583_v25  ;;  %vm1604_vm11 = vweird.f32 %v2349_v6  ;;  %v1418_v56 = vsel %vm1415_vm2, %v1417_v54, %v1413_v52  ;;  %vm1591_vm6 = vmor %vm1589_vm4, %vm1590_vm0  ;;  %v1695_v25 = vld [vmem:[#allocation10 + $0x70] sm:$0xff]  ;;  %1701 = vmatpush.msrb.mxu2 %v1696_v44  ;;  %v1690_v46 = vld [vmem:[#allocation10 + $0x48] sm:$0xff] }
 0x5ba   :  { %1663 = vmatpush.msrb.mxu1 %v1643_v18  ;;  %v1586_v37 = vsub.f32 1.0, %v1585_v43  ;;  %vm1605_vm15 = vmor %vm1603_vm14, %vm1604_vm11  ;;  %v1433_v63 = vmul.f32 %v2883_v26, %v1418_v56  ;;  %v1686_v43 = vld [vmem:[#allocation10 + $0x28] sm:$0xff]  ;;  %vm1676_vm11 = vcmask 1048448   ;;  %v1835_v44 = vld [vmem:[#allocation12 + $0x190] sm:$0xff] }
 0x5bb   :  { %v1422_v34 = vmul.f32 %v2345_v21, %v1421_v27  ;;  %v1600_v9 = vsub.f32 1.0, %v1599_v23  ;;  %1702 = vmatpush.msrb.mxu2 %v1695_v25  ;;  %v1687_v27 = vld [vmem:[#allocation10 + $0x30] sm:$0xff]  ;;  %v1836_v25 = vld [vmem:[#allocation12 + $0x198] sm:$0xff] }
 0x5bc   :  { %v1587_v51 = vmul.f32 %v2978_v22, %v1586_v37 }
 0x5bd   :  { %v1423_v35 = vadd.f32 %v2345_v21, %v1422_v34  ;;  %v1601_v36 = vmul.f32 %v2349_v6, %v1600_v9  ;;  %1703 = vmatpush.msrb.mxu2 %v1694_v40  ;;  %v1683_v34 = vld [vmem:[#allocation10 + $0x10] sm:$0xff]  ;;  %v1829_v40 = vld [vmem:[#allocation12 + $0x160] sm:$0xff] }
 0x5be   :  { %v1588_v59 = vadd.f32 %v2978_v22, %v1587_v51 }
 0x5bf   :  { %v1427_v12 = vsel %vm1426_vm9, %v2345_v21, %v1423_v35  ;;  %v1602_v38 = vadd.f32 %v2349_v6, %v1601_v36  ;;  %v1692_v21 = vld [vmem:[#allocation10 + $0x58] sm:$0xff]  ;;  %1704 = vmatpush.msrb.mxu2 %v1693_v20  ;;  %vm1318_vm9 = vcmask 786048   ;;  %v1682_v35 = vld [vmem:[#allocation10 + $0x8] sm:$0xff]  ;;  %v1681_v36 = vld [vmem:[#allocation10] sm:$0xff] }
 0x5c0   :  { %v1432_v45 = vsel %vm1429_vm10, %v1431_v15, %v1427_v12  ;;  %v1592_v1 = vsel %vm1591_vm6, %v2978_v22, %v1588_v59  ;;  %v1691_v22 = vld [vmem:[#allocation10 + $0x50] sm:$0xff]  ;;  %vm1497_vm10 = vcmask 917248   ;;  %v1845_v59 = vld [vmem:[#allocation12 + $0x1e0] sm:$0xff]  ;;  %v1830_v20 = vld [vmem:[#allocation12 + $0x168] sm:$0xff] }
 0x5c1   :  { %v1434_v50 = vmul.f32 %v2889_v19, %v1432_v45  ;;  %v1606_v53 = vsel %vm1605_vm15, %v2349_v6, %v1602_v38  ;;  %v1593_v19 = vand.u32 2147483647, %v2920_v10  ;;  %1705 = vmatpush.msrb.mxu2 %v1692_v21  ;;  %v1688_v6 = vld [vmem:[#allocation10 + $0x38] sm:$0xff]  ;;  %1859 = vmatpush.msrb.mxu3 %v1845_v59  ;;  %v1831_v21 = vld [vmem:[#allocation12 + $0x170] sm:$0xff]  ;;  %v1793_v59 = vld [vmem:[#allocation12 + $0x40] sm:$0xff] }
 0x5c2   :  { %v1611_v58 = vsel %vm1608_vm3, %v1610_v55, %v1606_v53  ;;  %v2280_v45 = vld [vmem:[%s3106_s4] ss:$0 sm:$0xff]  ;;  %v2361_v53 = vld [vmem:[#allocation4 + $0x8] sm:$0xff]  ;;  %v2558_v55 = vmov 128.0  }
 0x5c3   :  { %2238 = vmatmul.msk.f32.vlgmr.msra.gmra.mxu1 %vm329_vm1, %v1434_v50  ;;  %v1613_v0 = vmul.f32 %v2891_v13, %v1611_v58  ;;  %vm1594_vm7 = vcmp.eq.f32.partialorder %v1593_v19, 8.507059e+37  ;;  %1706 = vmatpush.msrb.mxu2 %v1691_v22  ;;  %2350 = vrcp.f32 %v2558_v55  ;;  %v1847_v19 = vld [vmem:[#allocation12 + $0x1f0] sm:$0xff]  ;;  %v1832_v22 = vld [vmem:[#allocation12 + $0x178] sm:$0xff]  ;;  %v1798_v55 = vld [vmem:[#allocation12 + $0x68] sm:$0xff] }
 0x5c4   :  { %v1597_v28 = vsel %vm1594_vm7, %v1596_v2, %v1592_v1  ;;  %1905 = vmatpush.msra.mxu1 %v1847_v19  ;;  %v1843_v2 = vld [vmem:[#allocation12 + $0x1d0] sm:$0xff] }
 0x5c5   :  { %v1612_v8 = vmul.f32 %v2863_v60, %v1597_v28  ;;  %1707 = vmatpush.msrb.mxu2 %v1690_v46  ;;  %v1844_v28 = vld [vmem:[#allocation12 + $0x1d8] sm:$0xff]  ;;  %v1826_v46 = vld [vmem:[#allocation12 + $0x148] sm:$0xff]  ;;  %v1795_v19 = vld [vmem:[#allocation12 + $0x50] sm:$0xff] }
 0x5c6   :  { %1906 = vmatpush.msra.mxu1 %v1843_v2  ;;  %v1792_v2 = vld [vmem:[#allocation12 + $0x38] sm:$0xff] }
 0x5c7   :  { %1708 = vmatpush.msrb.mxu2 %v1689_v24  ;;  %v1827_v24 = vld [vmem:[#allocation12 + $0x150] sm:$0xff] }
 0x5c8   :  { %v1437_v62 = vpop.permute.xlu1 %1436 }
 0x5c9   :  { %1457 = vmatpush.msrb.mxu0 %v1437_v62  ;;  %1709 = vmatpush.msrb.mxu2 %v1688_v6  ;;  %v2351_v56 = vpop.eup %2350  ;;  %v1848_v62 = vld [vmem:[#allocation12 + $0x1f8] sm:$0xff] }
 0x5ca   :  { %2237 = vmatmul.msk.f32.vlgmr.msrb.gmra.mxu0 %vm329_vm1, %v1433_v63  ;;  %v1733_v58 = vmul.f32 128.0, %v2351_v56  ;;  %v1841_v63 = vld [vmem:[#allocation12 + $0x1c0] sm:$0xff]  ;;  %vm1737_vm12 = vweird.f32 %v2351_v56  ;;  %v1828_v6 = vld [vmem:[#allocation12 + $0x158] sm:$0xff] }
 0x5cb   :  { %2244 = vmatmul.msk.f32.vlgmr.msrb.gmra.mxu1 %vm329_vm1, %v1613_v0  ;;  %1636 = vmatpush.msra.mxu0 %v2970_v49  ;;  %v1842_v0 = vld [vmem:[#allocation12 + $0x1c8] sm:$0xff] }
 0x5cc   :  { %1710 = vmatpush.msrb.mxu2 %v1687_v27  ;;  %v1734_v1 = vsub.f32 1.0, %v1733_v58  ;;  %1860 = vmatpush.msrb.mxu3 %v1841_v63  ;;  %v1821_v27 = vld [vmem:[#allocation12 + $0x120] sm:$0xff]  ;;  %v1800_v58 = vld [vmem:[#allocation12 + $0x78] sm:$0xff] }
 0x5cd   :  { %1882 = vmatpush.msrb.mxu0 %v1846_v61  ;;  %v1794_v61 = vld [vmem:[#allocation12 + $0x48] sm:$0xff]  ;;  %v1789_v63 = vld [vmem:[#allocation12 + $0x20] sm:$0xff] }
 0x5ce   :  { %1711 = vmatpush.msrb.mxu2 %v1686_v43  ;;  %v1823_v43 = vld [vmem:[#allocation12 + $0x130] sm:$0xff] }
 0x5cf   :  { %1883 = vmatpush.msrb.mxu0 %v1842_v0  ;;  %v1790_v0 = vld [vmem:[#allocation12 + $0x28] sm:$0xff] }
 0x5d0   :  { %v776_v10 = vpop.permute.xlu1 %775  ;;  %1712 = vmatpush.msrb.mxu2 %v1685_v29  ;;  %v1824_v29 = vld [vmem:[#allocation12 + $0x138] sm:$0xff] }
 0x5d1   :  { %782 = vst.msk [vmem:[#allocation3] sm:$0xff] %vm781_vm8, %v776_v10  ;;  %v1735_v10 = vmul.f32 %v2351_v56, %v1734_v1  ;;  %v1791_v1 = vld [vmem:[#allocation12 + $0x30] sm:$0xff] }
 0x5d2   :  { %2243 = vmatmul.msk.f32.vlgmr.msra.gmra.mxu0 %vm329_vm1, %v1612_v8  ;;  %vm960_vm1 = vcmask 523648   ;;  %1713 = vmatpush.msrb.mxu2 %v1684_v32  ;;  %v1818_v32 = vld [vmem:[#allocation12 + $0x108] sm:$0xff] }
 0x5d3   :  { %v1736_v8 = vadd.f32 %v2351_v56, %v1735_v10  ;;  %v1786_v10 = vld [vmem:[#allocation12 + $0x8] sm:$0xff] }
 0x5d4   :  { %1714 = vmatpush.msrb.mxu2 %v1683_v34  ;;  %v1819_v34 = vld [vmem:[#allocation12 + $0x110] sm:$0xff] }
 0x5d6   :  { %1715 = vmatpush.msrb.mxu2 %v1682_v35  ;;  %v1813_v35 = vld [vmem:[#allocation12 + $0xe0] sm:$0xff] }
 0x5d8   :  { %1716 = vmatpush.msrb.mxu2 %v1681_v36  ;;  %v1814_v36 = vld [vmem:[#allocation12 + $0xe8] sm:$0xff] }
 0x5da   :  { %1928 = vmatpush.msra.mxu2 %v1848_v62  ;;  %v1796_v62 = vld [vmem:[#allocation12 + $0x58] sm:$0xff] }
 0x5dc   :  { %1929 = vmatpush.msra.mxu2 %v1844_v28  ;;  %v1785_v28 = vld [vmem:[#allocation12] sm:$0xff] }
 0x5fc   :  { %v770_v26 = vpop.f32.mrf.mxu1 }
 0x5fd   :  { %777 = vrot.lane.b32.xlu2 %v770_v26, %s2550_s20  ;;  %v3021_v26 = vsel %vm1737_vm12, %v2351_v56, %v1736_v8  ;;  %v1799_v56 = vld [vmem:[#allocation12 + $0x70] sm:$0xff]  ;;  %s2181_s20 = sshll.u32 %s3115_s13, 4  ;;  %s2182_s20 = int_to_ptr.hbm [resolvable:$true] %s2181_s20 }
 0x5fe   :  { %v1787_v8 = vld [vmem:[#allocation12 + $0x10] sm:$0xff] }
 0x604   :  { %v949_v13 = vpop.f32.mrf.mxu1 }
 0x605   :  { %956 = vrot.lane.b32.xlu0 %v949_v13, %s2556_s26 }
 0x60c   :  { %v1128_v7 = vpop.f32.mrf.mxu1 }
 0x60e   :  { %v599_v3 = vpop.permute.xlu1 %598 }
 0x60f   :  { %604 = vst.msk [vmem:[#allocation3 + $0x8] sm:$0xff] %vm602_vm5, %v599_v3  ;;  %vm1139_vm5 = vcmask 654848  }
 0x61a   :  { %v922_v4 = vpop.f32.mrf.mxu0 }
 0x61b   :  { %954 = vrot.lane.b32.xlu2 %v922_v4, %s2556_s26 }
 0x61d   :  { %v1307_v49 = vpop.f32.mrf.mxu1 }
 0x622   :  { %v1101_v5 = vpop.f32.mrf.mxu0 }
 0x623   :  { %1133 = vrot.lane.b32.xlu0 %v1101_v5, %s2554_s24 }
 0x62a   :  { %v1280_v60 = vpop.f32.mrf.mxu0 }
 0x62b   :  { %1312 = vrot.lane.b32.xlu1 %v1280_v60, %s2555_s25 }
 0x633   :  { %1135 = vrot.lane.b32.xlu1 %v1128_v7, %s2554_s24 }
 0x640   :  { %v1486_v11 = vpop.f32.mrf.mxu1 }
 0x647   :  { %v1459_v30 = vpop.f32.mrf.mxu0 }
 0x648   :  { %v1665_v14 = vpop.f32.mrf.mxu1  ;;  %1491 = vrot.lane.b32.xlu2 %v1459_v30, %s2553_s7  ;;  %v1837_v30 = vld [vmem:[#allocation12 + $0x1a0] sm:$0xff] }
 0x649   :  { %1672 = vrot.lane.b32.xlu1 %v1665_v14, %s2552_s5  ;;  %v1838_v14 = vld [vmem:[#allocation12 + $0x1a8] sm:$0xff]  ;;  %1861 = vmatpush.msrb.mxu3 %v1837_v30  ;;  %v1989_v30 = vld [vmem:[#allocation13 + $0xf0] sm:$0xff] }
 0x64a   :  { %1884 = vmatpush.msrb.mxu0 %v1838_v14  ;;  %v2005_v14 = vld [vmem:[#allocation13 + $0x170] sm:$0xff] }
 0x64f   :  { %v1638_v16 = vpop.f32.mrf.mxu0 }
 0x650   :  { %1314 = vrot.lane.b32.xlu2 %v1307_v49, %s2555_s25  ;;  %1670 = vrot.lane.b32.xlu0 %v1638_v16, %s2552_s5  ;;  %v1839_v16 = vld [vmem:[#allocation12 + $0x1b0] sm:$0xff] }
 0x651   :  { %1907 = vmatpush.msra.mxu1 %v1839_v16 }
 0x653   :  { %1908 = vmatpush.msra.mxu1 %v1835_v44 }
 0x655   :  { %1909 = vmatpush.msra.mxu1 %v1831_v21  ;;  %v1987_v21 = vld [vmem:[#allocation13 + $0xe0] sm:$0xff] }
 0x657   :  { %v778_v17 = vpop.permute.xlu2 %777  ;;  %1910 = vmatpush.msra.mxu1 %v1827_v24 }
 0x658   :  { %783 = vst.msk [vmem:[#allocation3 + $0x8] sm:$0xff] %vm781_vm8, %v778_v17  ;;  %1493 = vrot.lane.b32.xlu0 %v1486_v11, %s2553_s7  ;;  %v1840_v17 = vld [vmem:[#allocation12 + $0x1b8] sm:$0xff] }
 0x659   :  { %1930 = vmatpush.msra.mxu2 %v1840_v17  ;;  %1911 = vmatpush.msra.mxu1 %v1823_v43  ;;  %v1988_v17 = vld [vmem:[#allocation13 + $0xe8] sm:$0xff]  ;;  %v2002_v43 = vld [vmem:[#allocation13 + $0x158] sm:$0xff] }
 0x65b   :  { %1931 = vmatpush.msra.mxu2 %v1836_v25  ;;  %1912 = vmatpush.msra.mxu1 %v1819_v34  ;;  %v2022_v25 = vld [vmem:[#allocation13 + $0x1f8] sm:$0xff]  ;;  %v1985_v34 = vld [vmem:[#allocation13 + $0xd0] sm:$0xff] }
 0x65d   :  { %1932 = vmatpush.msra.mxu2 %v1832_v22  ;;  %v2003_v22 = vld [vmem:[#allocation13 + $0x160] sm:$0xff] }
 0x65f   :  { %1933 = vmatpush.msra.mxu2 %v1828_v6  ;;  %v1972_v6 = vld [vmem:[#allocation13 + $0x68] sm:$0xff] }
 0x661   :  { %1934 = vmatpush.msra.mxu2 %v1824_v29 }
 0x675   :  { %v955_v18 = vpop.permute.xlu2 %954 }
 0x676   :  { %961 = vst.msk [vmem:[#allocation3] sm:$0xff] %vm960_vm1, %v955_v18  ;;  %v1833_v18 = vld [vmem:[#allocation12 + $0x180] sm:$0xff] }
 0x677   :  { %v957_v33 = vpop.permute.xlu0 %956  ;;  %1862 = vmatpush.msrb.mxu3 %v1833_v18  ;;  %v2004_v18 = vld [vmem:[#allocation13 + $0x168] sm:$0xff] }
 0x678   :  { %962 = vst.msk [vmem:[#allocation3 + $0x8] sm:$0xff] %vm960_vm1, %v957_v33  ;;  %v1834_v33 = vld [vmem:[#allocation12 + $0x188] sm:$0xff] }
 0x679   :  { %1885 = vmatpush.msrb.mxu0 %v1834_v33  ;;  %1863 = vmatpush.msrb.mxu3 %v1829_v40  ;;  %v1974_v33 = vld [vmem:[#allocation13 + $0x78] sm:$0xff]  ;;  %v1973_v40 = vld [vmem:[#allocation13 + $0x70] sm:$0xff] }
 0x67b   :  { %1886 = vmatpush.msrb.mxu0 %v1830_v20 }
 0x67d   :  { %1887 = vmatpush.msrb.mxu0 %v1826_v46 }
 0x695   :  { %v1134_v39 = vpop.permute.xlu0 %1133 }
 0x696   :  { %1140 = vst.msk [vmem:[#allocation3] sm:$0xff] %vm1139_vm5, %v1134_v39  ;;  %v1825_v39 = vld [vmem:[#allocation12 + $0x140] sm:$0xff] }
 0x697   :  { %1864 = vmatpush.msrb.mxu3 %v1825_v39  ;;  %v2021_v39 = vld [vmem:[#allocation13 + $0x1f0] sm:$0xff] }
 0x699   :  { %1865 = vmatpush.msrb.mxu3 %v1821_v27  ;;  %v2020_v27 = vld [vmem:[#allocation13 + $0x1e8] sm:$0xff] }
 0x69d   :  { %v1313_v23 = vpop.permute.xlu1 %1312 }
 0x69e   :  { %1319 = vst.msk [vmem:[#allocation3] sm:$0xff] %vm1318_vm9, %v1313_v23  ;;  %v1822_v23 = vld [vmem:[#allocation12 + $0x128] sm:$0xff] }
 0x69f   :  { %1888 = vmatpush.msrb.mxu0 %v1822_v23  ;;  %v1986_v23 = vld [vmem:[#allocation13 + $0xd8] sm:$0xff] }
 0x6a1   :  { %1889 = vmatpush.msrb.mxu0 %v1818_v32  ;;  %v2019_v32 = vld [vmem:[#allocation13 + $0x1e0] sm:$0xff] }
 0x6a2   :  { %v1492_v31 = vpop.permute.xlu2 %1491 }
 0x6a3   :  { %1498 = vst.msk [vmem:[#allocation3] sm:$0xff] %vm1497_vm10, %v1492_v31  ;;  %v1817_v31 = vld [vmem:[#allocation12 + $0x100] sm:$0xff]  ;;  %1890 = vmatpush.msrb.mxu0 %v1814_v36  ;;  %v1970_v36 = vld [vmem:[#allocation13 + $0x58] sm:$0xff] }
 0x6a4   :  { %1866 = vmatpush.msrb.mxu3 %v1817_v31  ;;  %v1971_v31 = vld [vmem:[#allocation13 + $0x60] sm:$0xff] }
 0x6a5   :  { %v1136_v9 = vpop.permute.xlu1 %1135 }
 0x6a6   :  { %1141 = vst.msk [vmem:[#allocation3 + $0x8] sm:$0xff] %vm1139_vm5, %v1136_v9  ;;  %v1820_v9 = vld [vmem:[#allocation12 + $0x118] sm:$0xff]  ;;  %1867 = vmatpush.msrb.mxu3 %v1813_v35 }
 0x6a7   :  { %1935 = vmatpush.msra.mxu2 %v1820_v9  ;;  %v2001_v9 = vld [vmem:[#allocation13 + $0x150] sm:$0xff] }
 0x6aa   :  { %v1315_v37 = vpop.permute.xlu2 %1314 }
 0x6ab   :  { %1320 = vst.msk [vmem:[#allocation3 + $0x8] sm:$0xff] %vm1318_vm9, %v1315_v37  ;;  %v1815_v37 = vld [vmem:[#allocation12 + $0xf0] sm:$0xff] }
 0x6ac   :  { %1913 = vmatpush.msra.mxu1 %v1815_v37  ;;  %v2018_v37 = vld [vmem:[#allocation13 + $0x1d8] sm:$0xff] }
 0x6bb   :  { %v1673_v38 = vpop.permute.xlu1 %1672 }
 0x6c2   :  { %v1671_v15 = vpop.permute.xlu0 %1670 }
 0x6c3   :  { %1677 = vst.msk [vmem:[#allocation3] sm:$0xff] %vm1676_vm11, %v1671_v15  ;;  %v1816_v15 = vld [vmem:[#allocation12 + $0xf8] sm:$0xff] }
 0x6c4   :  { %1936 = vmatpush.msra.mxu2 %v1816_v15  ;;  %v1984_v15 = vld [vmem:[#allocation13 + $0xc8] sm:$0xff] }
 0x6ca   :  { %v1494_v42 = vpop.permute.xlu0 %1493  ;;  %v1679_v12 = vld [vmem:[#allocation3] sm:$0xff] }
 0x6cb   :  { %1499 = vst.msk [vmem:[#allocation3 + $0x8] sm:$0xff] %vm1497_vm10, %v1494_v42  ;;  %1717 = vmatmul.f32.vlgmr.msrb.gmra.mxu2 %v1679_v12  ;;  %v1809_v42 = vld [vmem:[#allocation12 + $0xc0] sm:$0xff]  ;;  %v1810_v12 = vld [vmem:[#allocation12 + $0xc8] sm:$0xff] }
 0x6cc   :  { %1678 = vst.msk [vmem:[#allocation3 + $0x8] sm:$0xff] %vm1676_vm11, %v1673_v38  ;;  %v1811_v38 = vld [vmem:[#allocation12 + $0xd0] sm:$0xff]  ;;  %1868 = vmatpush.msrb.mxu3 %v1809_v42  ;;  %1891 = vmatpush.msrb.mxu0 %v1810_v12  ;;  %v2000_v42 = vld [vmem:[#allocation13 + $0x148] sm:$0xff] }
 0x6cd   :  { %1914 = vmatpush.msra.mxu1 %v1811_v38  ;;  %v1969_v38 = vld [vmem:[#allocation13 + $0x50] sm:$0xff] }
 0x6d3   :  { %v1680_v41 = vld [vmem:[#allocation3 + $0x8] sm:$0xff] }
 0x6d4   :  { %1720 = vmatmul.f32.gmra.mxu2 %v1680_v41  ;;  %v1812_v41 = vld [vmem:[#allocation12 + $0xd8] sm:$0xff] }
 0x6d5   :  { %1937 = vmatpush.msra.mxu2 %v1812_v41  ;;  %v2017_v41 = vld [vmem:[#allocation13 + $0x1d0] sm:$0xff] }
 0x74e   :  { %v1718_v57 = vpop.f32.mrf.mxu2 }
 0x74f   :  { %v1719_v47 = vadd.f32 %v2280_v45, %v1718_v57  ;;  %v1806_v57 = vld [vmem:[#allocation12 + $0xa8] sm:$0xff] }
 0x750   :  { %1892 = vmatpush.msrb.mxu0 %v1806_v57  ;;  %v1999_v57 = vld [vmem:[#allocation13 + $0x140] sm:$0xff] }
 0x751   :  { %v1724_v50 = vadd.f32 %v2360_v48, %v1719_v47  ;;  %v1807_v47 = vld [vmem:[#allocation12 + $0xb0] sm:$0xff]  ;;  %v1808_v48 = vld [vmem:[#allocation12 + $0xb8] sm:$0xff] }
 0x752   :  { %1915 = vmatpush.msra.mxu1 %v1807_v47  ;;  %1938 = vmatpush.msra.mxu2 %v1808_v48  ;;  %v3050_v48 = vld [vmem:[%s3111_s9] ss:$0 sm:$0xff] }
 0x753   :  { %1728 = vadd.xlane.f32.xlu2 %v1724_v50 }
 0x757   :  { %v1721_v51 = vpop.f32.mrf.mxu2 }
 0x758   :  { %v1722_v52 = vadd.f32 %v2280_v45, %v1721_v51  ;;  %v1805_v45 = vld [vmem:[#allocation12 + $0xa0] sm:$0xff]  ;;  %v1802_v51 = vld [vmem:[#allocation12 + $0x88] sm:$0xff] }
 0x759   :  { %1869 = vmatpush.msrb.mxu3 %v1805_v45  ;;  %1893 = vmatpush.msrb.mxu0 %v1802_v51  ;;  %v1983_v45 = vld [vmem:[#allocation13 + $0xc0] sm:$0xff]  ;;  %v1968_v51 = vld [vmem:[#allocation13 + $0x48] sm:$0xff] }
 0x75a   :  { %v1725_v54 = vadd.f32 %v2361_v53, %v1722_v52  ;;  %v1803_v52 = vld [vmem:[#allocation12 + $0x90] sm:$0xff]  ;;  %v1804_v53 = vld [vmem:[#allocation12 + $0x98] sm:$0xff] }
 0x75b   :  { %1916 = vmatpush.msra.mxu1 %v1803_v52  ;;  %1939 = vmatpush.msra.mxu2 %v1804_v53  ;;  %v2016_v52 = vld [vmem:[#allocation13 + $0x1c8] sm:$0xff] }
 0x75c   :  { %1730 = vadd.xlane.f32.xlu0 %v1725_v54  ;;  %1894 = vmatpush.msrb.mxu0 %v1798_v55  ;;  %v1998_v55 = vld [vmem:[#allocation13 + $0x138] sm:$0xff] }
 0x75d   :  { %1917 = vmatpush.msra.mxu1 %v1799_v56  ;;  %1940 = vmatpush.msra.mxu2 %v1800_v58  ;;  %v1967_v58 = vld [vmem:[#allocation13 + $0x40] sm:$0xff] }
 0x75e   :  { %1895 = vmatpush.msrb.mxu0 %v1794_v61 }
 0x75f   :  { %1918 = vmatpush.msra.mxu1 %v1795_v19  ;;  %1941 = vmatpush.msra.mxu2 %v1796_v62  ;;  %v2282_v62 = vld [vmem:[%s3112_s10] ss:$0 sm:$0xff] }
 0x760   :  { %1896 = vmatpush.msrb.mxu0 %v1790_v0  ;;  %v1997_v0 = vld [vmem:[#allocation13 + $0x130] sm:$0xff] }
 0x761   :  { %1919 = vmatpush.msra.mxu1 %v1791_v1  ;;  %1942 = vmatpush.msra.mxu2 %v1792_v2  ;;  %v1966_v1 = vld [vmem:[#allocation13 + $0x38] sm:$0xff] }
 0x762   :  { %1897 = vmatpush.msrb.mxu0 %v1786_v10  ;;  %v2014_v2 = vld [vmem:[#allocation13 + $0x1b8] sm:$0xff] }
 0x763   :  { %1920 = vmatpush.msra.mxu1 %v1787_v8  ;;  %v1980_v8 = vld [vmem:[#allocation13 + $0xa8] sm:$0xff] }
 0x7c6   :  { %v1729_v13 = vpop.xlane.xlu2 %1728 }
 0x7c7   :  { %v1739_v3 = vmul.f32 %v3021_v26, %v1729_v13  ;;  %v1788_v13 = vld [vmem:[#allocation12 + $0x18] sm:$0xff] }
 0x7c8   :  { %1943 = vmatpush.msra.mxu2 %v1788_v13  ;;  %v1996_v13 = vld [vmem:[#allocation13 + $0x128] sm:$0xff] }
 0x7c9   :  { %v3024_v4 = vsub.f32 %v1724_v50, %v1739_v3  ;;  %v1801_v50 = vld [vmem:[#allocation12 + $0x80] sm:$0xff] }
 0x7ca   :  { %1870 = vmatpush.msrb.mxu3 %v1801_v50  ;;  %2096 = vmatpush.msrb.mxu2 %v2022_v25  ;;  %v1964_v25 = vld [vmem:[#allocation13 + $0x28] sm:$0xff] }
 0x7cb   :  { %v1743_v5 = vmul.f32 %v3024_v4, %v3024_v4 }
 0x7cc   :  { %2097 = vmatpush.msrb.mxu2 %v2021_v39  ;;  %v1992_v39 = vld [vmem:[#allocation13 + $0x108] sm:$0xff] }
 0x7cd   :  { %1745 = vadd.xlane.f32.xlu1 %v1743_v5 }
 0x7ce   :  { %2098 = vmatpush.msrb.mxu2 %v2020_v27  ;;  %v1991_v27 = vld [vmem:[#allocation13 + $0x100] sm:$0xff] }
 0x7cf   :  { %v1731_v60 = vpop.xlane.xlu0 %1730 }
 0x7d0   :  { %v1740_v7 = vmul.f32 %v3021_v26, %v1731_v60  ;;  %2099 = vmatpush.msrb.mxu2 %v2019_v32  ;;  %v2008_v32 = vld [vmem:[#allocation13 + $0x188] sm:$0xff] }
 0x7d2   :  { %v3029_v49 = vsub.f32 %v1725_v54, %v1740_v7  ;;  %v1797_v54 = vld [vmem:[#allocation12 + $0x60] sm:$0xff]  ;;  %v1990_v7 = vld [vmem:[#allocation13 + $0xf8] sm:$0xff]  ;;  %2100 = vmatpush.msrb.mxu2 %v2018_v37 }
 0x7d3   :  { %1871 = vmatpush.msrb.mxu3 %v1797_v54  ;;  %2050 = vmatpush.msra.mxu0 %v1990_v7  ;;  %v1982_v54 = vld [vmem:[#allocation13 + $0xb8] sm:$0xff] }
 0x7d4   :  { %v1744_v11 = vmul.f32 %v3029_v49, %v3029_v49  ;;  %2101 = vmatpush.msrb.mxu2 %v2017_v41 }
 0x7d5   :  { %1872 = vmatpush.msrb.mxu3 %v1793_v59  ;;  %2051 = vmatpush.msra.mxu0 %v1989_v30  ;;  %v2015_v59 = vld [vmem:[#allocation13 + $0x1c0] sm:$0xff]  ;;  %v2013_v30 = vld [vmem:[#allocation13 + $0x1b0] sm:$0xff] }
 0x7d6   :  { %1747 = vadd.xlane.f32.xlu2 %v1744_v11  ;;  %v2006_v11 = vld [vmem:[#allocation13 + $0x178] sm:$0xff]  ;;  %2102 = vmatpush.msrb.mxu2 %v2016_v52 }
 0x7d7   :  { %1873 = vmatpush.msrb.mxu3 %v1789_v63  ;;  %2073 = vmatpush.msrb.mxu1 %v2006_v11  ;;  %v1981_v63 = vld [vmem:[#allocation13 + $0xb0] sm:$0xff] }
 0x7d8   :  { %2052 = vmatpush.msra.mxu0 %v1988_v17  ;;  %2103 = vmatpush.msrb.mxu2 %v2015_v59  ;;  %v1965_v11 = vld [vmem:[#allocation13 + $0x30] sm:$0xff] }
 0x7d9   :  { %1874 = vmatpush.msrb.mxu3 %v1785_v28  ;;  %2074 = vmatpush.msrb.mxu1 %v2005_v14  ;;  %v1978_v14 = vld [vmem:[#allocation13 + $0x98] sm:$0xff] }
 0x7da   :  { %2053 = vmatpush.msra.mxu0 %v1987_v21  ;;  %2104 = vmatpush.msrb.mxu2 %v2014_v2  ;;  %v1963_v21 = vld [vmem:[#allocation13 + $0x20] sm:$0xff] }
 0x7db   :  { %2027 = vmatpush.msra.mxu3 %v1974_v33  ;;  %2075 = vmatpush.msrb.mxu1 %v2004_v18 }
 0x7dc   :  { %2054 = vmatpush.msra.mxu0 %v1986_v23  ;;  %2105 = vmatpush.msrb.mxu2 %v2013_v30  ;;  %v2010_v23 = vld [vmem:[#allocation13 + $0x198] sm:$0xff] }
 0x7dd   :  { %2028 = vmatpush.msra.mxu3 %v1973_v40  ;;  %2076 = vmatpush.msrb.mxu1 %v2003_v22  ;;  %v1977_v40 = vld [vmem:[#allocation13 + $0x90] sm:$0xff]  ;;  %v1976_v22 = vld [vmem:[#allocation13 + $0x88] sm:$0xff] }
 0x7de   :  { %2055 = vmatpush.msra.mxu0 %v1985_v34  ;;  %v1959_v34 = vld [vmem:[#allocation13] sm:$0xff] }
 0x7df   :  { %2029 = vmatpush.msra.mxu3 %v1972_v6  ;;  %2077 = vmatpush.msrb.mxu1 %v2002_v43  ;;  %v1975_v6 = vld [vmem:[#allocation13 + $0x80] sm:$0xff]  ;;  %v1961_v43 = vld [vmem:[#allocation13 + $0x10] sm:$0xff] }
 0x7e0   :  { %2056 = vmatpush.msra.mxu0 %v1984_v15 }
 0x7e1   :  { %2030 = vmatpush.msra.mxu3 %v1971_v31  ;;  %2078 = vmatpush.msrb.mxu1 %v2001_v9  ;;  %v1960_v31 = vld [vmem:[#allocation13 + $0x8] sm:$0xff]  ;;  %v2007_v9 = vld [vmem:[#allocation13 + $0x180] sm:$0xff] }
 0x7e2   :  { %2057 = vmatpush.msra.mxu0 %v1983_v45 }
 0x7e3   :  { %2031 = vmatpush.msra.mxu3 %v1970_v36  ;;  %2079 = vmatpush.msrb.mxu1 %v2000_v42 }
 0x7e4   :  { %2058 = vmatpush.msra.mxu0 %v1982_v54 }
 0x7e5   :  { %2032 = vmatpush.msra.mxu3 %v1969_v38  ;;  %2080 = vmatpush.msrb.mxu1 %v1999_v57 }
 0x7e6   :  { %2059 = vmatpush.msra.mxu0 %v1981_v63 }
 0x7e7   :  { %2033 = vmatpush.msra.mxu3 %v1968_v51  ;;  %2081 = vmatpush.msrb.mxu1 %v1998_v55 }
 0x7e8   :  { %2060 = vmatpush.msra.mxu0 %v1980_v8 }
 0x7e9   :  { %2034 = vmatpush.msra.mxu3 %v1967_v58  ;;  %2082 = vmatpush.msrb.mxu1 %v1997_v0 }
 0x7eb   :  { %2035 = vmatpush.msra.mxu3 %v1966_v1  ;;  %2083 = vmatpush.msrb.mxu1 %v1996_v13 }
 0x7ed   :  { %2036 = vmatpush.msra.mxu3 %v1965_v11 }
 0x7ef   :  { %2037 = vmatpush.msra.mxu3 %v1964_v25 }
 0x7f1   :  { %2038 = vmatpush.msra.mxu3 %v1963_v21 }
 0x840   :  { %v1746_v3 = vpop.xlane.xlu1 %1745 }
 0x841   :  { %v1749_v5 = vmul.f32 %v1746_v3, %v3021_v26 }
 0x843   :  { %v3034_v60 = vadd.f32 1e-05, %v1749_v5  ;;  %v1979_v5 = vld [vmem:[#allocation13 + $0xa0] sm:$0xff] }
 0x844   :  { %2061 = vmatpush.msra.mxu0 %v1979_v5 }
 0x845   :  { %2352 = vrsqrt.f32 %v3034_v60  ;;  %vm1759_vm14 = vweird.f32 %v3034_v60 }
 0x846   :  { %2062 = vmatpush.msra.mxu0 %v1978_v14 }
 0x848   :  { %2063 = vmatpush.msra.mxu0 %v1977_v40 }
 0x849   :  { %v1748_v16 = vpop.xlane.xlu2 %1747 }
 0x84a   :  { %v1750_v44 = vmul.f32 %v1748_v16, %v3021_v26  ;;  %v1994_v16 = vld [vmem:[#allocation13 + $0x118] sm:$0xff]  ;;  %2064 = vmatpush.msra.mxu0 %v1976_v22 }
 0x84b   :  { %v3038_v20 = vpop.eup %2352 }
 0x84c   :  { %v1754_v46 = vmul.f32 %v3038_v20, %v3034_v60  ;;  %v3042_v24 = vadd.f32 1e-05, %v1750_v44  ;;  %vm1760_vm13 = vweird.f32 %v3038_v20  ;;  %v1995_v60 = vld [vmem:[#allocation13 + $0x120] sm:$0xff]  ;;  %2065 = vmatpush.msra.mxu0 %v1975_v6 }
 0x84d   :  { %vm1761_vm15 = vmor %vm1759_vm14, %vm1760_vm13  ;;  %2084 = vmatpush.msrb.mxu1 %v1995_v60 }
 0x84e   :  { %v1755_v29 = vmul.f32 %v3038_v20, %v1754_v46  ;;  %2354 = vrsqrt.f32 %v3042_v24  ;;  %vm1769_vm3 = vweird.f32 %v3042_v24  ;;  %v2011_v46 = vld [vmem:[#allocation13 + $0x1a0] sm:$0xff] }
 0x84f   :  { %2085 = vmatpush.msrb.mxu1 %v1994_v16 }
 0x850   :  { %v1756_v35 = vmul.f32 0.5, %v1755_v29  ;;  %v2009_v29 = vld [vmem:[#allocation13 + $0x190] sm:$0xff] }
 0x852   :  { %v1757_v12 = vsub.f32 1.5, %v1756_v35  ;;  %v1849_v35 = vld [vmem:[%s3108_s6] sm:$0xf] }
 0x853   :  { %v1852_v36 = vperm.slane %v1849_v35, 1  ;;  %v1853_v37 = vperm.slane %v1849_v35, 2  ;;  %v1851_v45 = vperm.slane %v1849_v35, 0 }
 0x854   :  { %v2355_v47 = vpop.eup %2354  ;;  %v1758_v50 = vmul.f32 %v3038_v20, %v1757_v12 }
 0x855   :  { %v1764_v53 = vmul.f32 %v2355_v47, %v3042_v24  ;;  %vm1770_vm2 = vweird.f32 %v2355_v47  ;;  %v1962_v24 = vld [vmem:[#allocation13 + $0x18] sm:$0xff] }
 0x856   :  { %v1762_v56 = vsel %vm1761_vm15, %v3038_v20, %v1758_v50  ;;  %vm1771_vm0 = vmor %vm1769_vm3, %vm1770_vm2  ;;  %v1993_v20 = vld [vmem:[#allocation13 + $0x110] sm:$0xff]  ;;  %2039 = vmatpush.msra.mxu3 %v1962_v24 }
 0x857   :  { %v1773_v61 = vmul.f32 %v1762_v56, %v3024_v4  ;;  %v1765_v19 = vmul.f32 %v2355_v47, %v1764_v53  ;;  %2086 = vmatpush.msrb.mxu1 %v1993_v20 }
 0x858   :  { %2040 = vmatpush.msra.mxu3 %v1961_v43 }
 0x859   :  { %v1778_v28 = vmul.f32 %v3050_v48, %v1773_v61  ;;  %v1766_v10 = vmul.f32 0.5, %v1765_v19  ;;  %2087 = vmatpush.msrb.mxu1 %v1992_v39 }
 0x85a   :  { %2041 = vmatpush.msra.mxu3 %v1960_v31 }
 0x85b   :  { %v1767_v4 = vsub.f32 1.5, %v1766_v10  ;;  %v3063_v3 = vadd.f32 %v2282_v62, %v1778_v28  ;;  %2088 = vmatpush.msrb.mxu1 %v1991_v27  ;;  %v2283_v10 = vld [vmem:[%s3110_s8] ss:$0 sm:$0xff] }
 0x85c   :  { %2042 = vmatpush.msra.mxu3 %v1959_v34 }
 0x85d   :  { %v1768_v7 = vmul.f32 %v2355_v47, %v1767_v4  ;;  %1875 = vmatmul.f32.vlgmr.msrb.gmra.mxu3 %v3063_v3  ;;  %1898 = vmatmul.f32.vlgmr.msrb.gmra.mxu0 %v3063_v3 }
 0x85e   :  { %1921 = vmatmul.f32.vlgmr.msra.gmra.mxu1 %v3063_v3  ;;  %1944 = vmatmul.f32.vlgmr.msra.gmra.mxu2 %v3063_v3 }
 0x85f   :  { %v1772_v17 = vsel %vm1771_vm0, %v2355_v47, %v1768_v7  ;;  %v1854_v47 = vperm.slane %v1849_v35, 3 }
 0x860   :  { %v1774_v18 = vmul.f32 %v1772_v17, %v3029_v49  ;;  %v2012_v49 = vld [vmem:[#allocation13 + $0x1a8] sm:$0xff] }
 0x861   :  { %2106 = vmatpush.msrb.mxu2 %v2012_v49 }
 0x862   :  { %v1779_v33 = vmul.f32 %v3050_v48, %v1774_v18 }
 0x863   :  { %2107 = vmatpush.msrb.mxu2 %v2011_v46 }
 0x864   :  { %v3072_v44 = vadd.f32 %v2282_v62, %v1779_v33 }
 0x865   :  { %2108 = vmatpush.msrb.mxu2 %v2010_v23 }
 0x866   :  { %1878 = vmatmul.f32.gmra.mxu3 %v3072_v44  ;;  %1901 = vmatmul.f32.gmra.mxu0 %v3072_v44 }
 0x867   :  { %1924 = vmatmul.f32.gmra.mxu1 %v3072_v44  ;;  %1947 = vmatmul.f32.gmra.mxu2 %v3072_v44 }
 0x868   :  { %2109 = vmatpush.msrb.mxu2 %v2009_v29 }
 0x86a   :  { %2110 = vmatpush.msrb.mxu2 %v2008_v32 }
 0x86c   :  { %2111 = vmatpush.msrb.mxu2 %v2007_v9 }
 0x8da   :  { %v1899_v15 = vpop.f32.mrf.mxu0 }
 0x8db   :  { %v1900_v42 = vadd.f32 %v1899_v15, %v1852_v36  ;;  %v1922_v12 = vpop.f32.mrf.mxu1 }
 0x8dc   :  { %v1923_v38 = vadd.f32 %v1922_v12, %v1853_v37 }
 0x8dd   :  { %v1952_v41 = vmax.f32 %v1900_v42, 0.0 }
 0x8de   :  { %v1953_v57 = vmax.f32 %v1923_v38, 0.0 }
 0x8df   :  { %2066 = vmatmul.f32.vlgmr.msra.gmra.mxu0 %v1952_v41  ;;  %v2284_v41 = vld [vmem:[%s3113_s11] ss:$0 sm:$0xff]  ;;  %s2179_s11 = sshll.u32 %s2559_s17, 4  ;;  %s2180_s11 = int_to_ptr.vmem [resolvable:$true] %s2179_s11 }
 0x8e0   :  { %2089 = vmatmul.f32.vlgmr.msrb.gmra.mxu1 %v1953_v57  ;;  %v1876_v48 = vpop.f32.mrf.mxu3 }
 0x8e1   :  { %v1877_v50 = vadd.f32 %v1876_v48, %v1851_v45  ;;  %v1945_v51 = vpop.f32.mrf.mxu2 }
 0x8e2   :  { %v1946_v52 = vadd.f32 %v1945_v51, %v1854_v47 }
 0x8e3   :  { %v1951_v53 = vmax.f32 %v1877_v50, 0.0  ;;  %v1902_v54 = vpop.f32.mrf.mxu0 }
 0x8e4   :  { %v1954_v55 = vmax.f32 %v1946_v52, 0.0  ;;  %v1903_v56 = vadd.f32 %v1902_v54, %v1852_v36  ;;  %v1925_v58 = vpop.f32.mrf.mxu1 }
 0x8e5   :  { %v1926_v59 = vadd.f32 %v1925_v58, %v1853_v37  ;;  %2043 = vmatmul.f32.vlgmr.msra.gmra.mxu3 %v1951_v53 }
 0x8e6   :  { %v1956_v61 = vmax.f32 %v1903_v56, 0.0  ;;  %2112 = vmatmul.f32.vlgmr.msrb.gmra.mxu2 %v1954_v55 }
 0x8e7   :  { %v1957_v19 = vmax.f32 %v1926_v59, 0.0 }
 0x8e8   :  { %2069 = vmatmul.f32.gmra.mxu0 %v1956_v61 }
 0x8e9   :  { %2092 = vmatmul.f32.gmra.mxu1 %v1957_v19  ;;  %v1879_v62 = vpop.f32.mrf.mxu3 }
 0x8ea   :  { %v1880_v63 = vadd.f32 %v1879_v62, %v1851_v45  ;;  %v1948_v0 = vpop.f32.mrf.mxu2 }
 0x8eb   :  { %v1949_v1 = vadd.f32 %v1948_v0, %v1854_v47  ;;  %v2285_v47 = vld [vmem:[%s3114_s12] ss:$0 sm:$0xff] }
 0x8ec   :  { %v1955_v2 = vmax.f32 %v1880_v63, 0.0 }
 0x8ed   :  { %v1958_v28 = vmax.f32 %v1949_v1, 0.0 }
 0x8ee   :  { %2046 = vmatmul.f32.gmra.mxu3 %v1955_v2 }
 0x8ef   :  { %2115 = vmatmul.f32.gmra.mxu2 %v1958_v28 }
 0x95c   :  { %v2067_v13 = vpop.f32.mrf.mxu0 }
 0x95d   :  { %v2090_v5 = vpop.f32.mrf.mxu1 }
 0x965   :  { %v2070_v18 = vpop.f32.mrf.mxu0 }
 0x966   :  { %v2093_v25 = vpop.f32.mrf.mxu1 }
 0x968   :  { %v2044_v8 = vpop.f32.mrf.mxu3 }
 0x969   :  { %v2045_v4 = vadd.f32 %v2283_v10, %v2044_v8  ;;  %v2113_v11 = vpop.f32.mrf.mxu2 }
 0x96b   :  { %v2068_v60 = vadd.f32 %v2067_v13, %v2045_v4 }
 0x96d   :  { %v2091_v7 = vadd.f32 %v2090_v5, %v2068_v60 }
 0x96f   :  { %v2114_v30 = vadd.f32 %v2113_v11, %v2091_v7 }
 0x971   :  { %v2047_v14 = vpop.f32.mrf.mxu3  ;;  %v2119_v16 = vadd.f32 %v2114_v30, %v3063_v3 }
 0x972   :  { %v2048_v17 = vadd.f32 %v2283_v10, %v2047_v14  ;;  %v2116_v20 = vpop.f32.mrf.mxu2 }
 0x973   :  { %2123 = vadd.xlane.f32.xlu0 %v2119_v16 }
 0x974   :  { %v2071_v33 = vadd.f32 %v2070_v18, %v2048_v17 }
 0x976   :  { %v2094_v40 = vadd.f32 %v2093_v25, %v2071_v33 }
 0x978   :  { %v2117_v49 = vadd.f32 %v2116_v20, %v2094_v40 }
 0x97a   :  { %v2120_v21 = vadd.f32 %v2117_v49, %v3072_v44 }
 0x97c   :  { %2125 = vadd.xlane.f32.xlu1 %v2120_v21 }
 0x9e6   :  { %v2124_v22 = vpop.xlane.xlu0 %2123 }
 0x9e7   :  { %v2127_v39 = vmul.f32 %v2124_v22, %v3021_v26 }
 0x9e9   :  { %v2129_v46 = vsub.f32 %v2119_v16, %v2127_v39 }
 0x9eb   :  { %v2131_v24 = vmul.f32 %v2129_v46, %v2129_v46 }
 0x9ed   :  { %2133 = vadd.xlane.f32.xlu2 %v2131_v24 }
 0x9ef   :  { %v2126_v6 = vpop.xlane.xlu1 %2125 }
 0x9f0   :  { %v2128_v3 = vmul.f32 %v2126_v6, %v3021_v26 }
 0x9f2   :  { %v2130_v27 = vsub.f32 %v2120_v21, %v2128_v3 }
 0x9f4   :  { %v2132_v23 = vmul.f32 %v2130_v27, %v2130_v27 }
 0x9f6   :  { %2135 = vadd.xlane.f32.xlu0 %v2132_v23 }
 0xa60   :  { %v2134_v43 = vpop.xlane.xlu2 %2133 }
 0xa61   :  { %v2137_v29 = vmul.f32 %v2134_v43, %v3021_v26 }
 0xa63   :  { %v2139_v31 = vadd.f32 1e-05, %v2137_v29 }
 0xa65   :  { %2356 = vrsqrt.f32 %v2139_v31  ;;  %vm2147_vm6 = vweird.f32 %v2139_v31 }
 0xa69   :  { %v2136_v32 = vpop.xlane.xlu0 %2135 }
 0xa6a   :  { %v2138_v44 = vmul.f32 %v2136_v32, %v3021_v26 }
 0xa6b   :  { %v2357_v34 = vpop.eup %2356 }
 0xa6c   :  { %v2142_v9 = vmul.f32 %v2357_v34, %v2139_v31  ;;  %v2140_v35 = vadd.f32 1e-05, %v2138_v44  ;;  %vm2148_vm4 = vweird.f32 %v2357_v34 }
 0xa6d   :  { %vm2149_vm7 = vmor %vm2147_vm6, %vm2148_vm4 }
 0xa6e   :  { %v2143_v36 = vmul.f32 %v2357_v34, %v2142_v9  ;;  %2358 = vrsqrt.f32 %v2140_v35  ;;  %vm2157_vm1 = vweird.f32 %v2140_v35 }
 0xa70   :  { %v2144_v37 = vmul.f32 0.5, %v2143_v36 }
 0xa72   :  { %v2145_v15 = vsub.f32 1.5, %v2144_v37 }
 0xa74   :  { %v2359_v42 = vpop.eup %2358  ;;  %v2146_v12 = vmul.f32 %v2357_v34, %v2145_v15 }
 0xa75   :  { %v2152_v38 = vmul.f32 %v2359_v42, %v2140_v35  ;;  %vm2158_vm8 = vweird.f32 %v2359_v42 }
 0xa76   :  { %v2150_v45 = vsel %vm2149_vm7, %v2357_v34, %v2146_v12  ;;  %vm2159_vm5 = vmor %vm2157_vm1, %vm2158_vm8 }
 0xa77   :  { %v2161_v57 = vmul.f32 %v2150_v45, %v2129_v46  ;;  %v2153_v26 = vmul.f32 %v2359_v42, %v2152_v38 }
 0xa79   :  { %v2154_v48 = vmul.f32 0.5, %v2153_v26  ;;  %v2166_v50 = vmul.f32 %v2284_v41, %v2161_v57 }
 0xa7b   :  { %v2155_v51 = vsub.f32 1.5, %v2154_v48  ;;  %v2171_v52 = vadd.f32 %v2285_v47, %v2166_v50 }
 0xa7d   :  { %v2156_v53 = vmul.f32 %v2359_v42, %v2155_v51  ;;  %2173 = vst [vmem:[#allocation15] sm:$0xff] %v2171_v52 }
 0xa7f   :  { %v2160_v54 = vsel %vm2159_vm5, %v2359_v42, %v2156_v53 }
 0xa80   :  { %v2162_v55 = vmul.f32 %v2160_v54, %v2130_v27 }
 0xa82   :  { %v2167_v56 = vmul.f32 %v2284_v41, %v2162_v55 }
 0xa84   :  { %v2172_v58 = vadd.f32 %v2285_v47, %v2167_v56 }
 0xa86   :  { %2174 = vst [vmem:[#allocation15 + $0x8] sm:$0xff] %v2172_v58 }
 0xa87   :  { %2187 = dma.vmem_to_hbm [thread:$0]  %s2180_s11, 256, %s2182_s20, [#allocation6], %s2544_s1, %s2544_s1, %s2545_s23  }
 0xa88   :  { %2538 = dma.done.wait [#allocation6], 256  }
 0xa89   :  { %2539 = vsyncadd [#allocation6], 4294967040 }
 0xa8a   :  { %2192 = vsyncpa [#allocation5], 1 }
 0xa8b   :  { %2193 = vsyncpa [#allocation8], 1 }
 0xa8c   :  { %2194 = vsyncpa [#allocation11], 1 }
 0xa8d   :  { %2195 = vsyncpa [#allocation14], 1 }
 0xa8e   :  { %2196 = vsyncpa [#allocation6], 1 }

</bundles_post_ra>
